<compile_context>
chip_gen: v7x
topology: tpu7x:2x2x1
jax: 0.10.0
libtpu: 0.0.40
codegen_flags: <defaults>
</compile_context>

<pallas_src>
import functools
import math

import jax
import jax.numpy as jnp
import numpy as np
from jax.experimental import pallas as pl
from jax.experimental.pallas import tpu as pltpu


# ----------------------------- helpers (in-kernel) -----------------------------

def _mm(a, b):
    return jnp.dot(a, b, preferred_element_type=jnp.float32)


def _mm_nt(a, b):  # a (m,k) contracted with b (n,k) -> (m,n)
    return jax.lax.dot_general(a, b, (((1,), (1,)), ((), ())),
                               preferred_element_type=jnp.float32)


def _ln(x, w, b, eps=1e-5):
    mean = jnp.mean(x, axis=-1, keepdims=True)
    var = jnp.mean(jnp.square(x - mean), axis=-1, keepdims=True)
    return (x - mean) * jax.lax.rsqrt(var + eps) * w + b


# ----------------------------- fused Pallas kernel -----------------------------

def context_encoder_kernel(x_ref, pe_ref, aidc_ref, aidr_ref, amask_ref,
                           wfc_ref, bfc_ref,
                           wqkv_ref, bqkv_ref, wout_ref, bout_ref,
                           l1w_ref, l1b_ref, l2w_ref, l2b_ref,
                           n1w_ref, n1b_ref, n2w_ref, n2b_ref,
                           ctx_ref, pool_ref,
                           *, nlayer, nhead, head_dim, num_agent, tlen):
    f32, bf16 = jnp.float32, jnp.bfloat16
    D = nhead * head_dim
    L = tlen * num_agent

    # ---- input_fc + positional encoding (fused) -------------------------------
    h = _mm(x_ref[...].astype(bf16), wfc_ref[...]) + bfc_ref[...] + pe_ref[...]

    # ---- masks generated in-kernel (no (L,L) HBM traffic) ----------------------
    aid_c = aidc_ref[...]                                    # (L, 1) agent id per row
    aid_r = aidr_ref[...]                                    # (1, L)
    same = aid_c == aid_r                                    # (L, L) bool mask
    lane_a = jax.lax.broadcasted_iota(jnp.int32, (L, num_agent), 1)
    sub_a = jax.lax.broadcasted_iota(jnp.int32, (num_agent, L), 0)
    R = (lane_a == aid_c).astype(bf16)                       # (L, N) one-hot agent rows
    Rt = (sub_a == aid_r).astype(bf16)                       # (N, L)
    # expand additive (N,N) agent mask to (L,L): amask[i,j] = A[aid[i], aid[j]].
    # -inf is clamped to -1e9 (intentional: fully-masked rows give a uniform
    # softmax instead of NaN); bf16 rounding of -1e9 is irrelevant after exp().
    A = jnp.maximum(amask_ref[...], -1e9).astype(bf16)
    amask = _mm(_mm(R, A).astype(bf16), Rt)                  # (L, L) additive src_mask

    # ---- transformer encoder layers (unrolled; weights stacked per layer) ------
    for l in range(nlayer):
        wqkv_l = wqkv_ref[l]                                 # (D, 5D) bf16 (q scaled)
        bqkv_l = bqkv_ref[l]                                 # (1, 5D) f32
        wout_l = wout_ref[l]                                 # (H, hd, D) bf16
        bout_l = bout_ref[l]                                 # (1, D) f32

        xb = h.astype(bf16)
        # one fused lane-dense projection; columns per head: [q|k|v|q_self|k_self]
        qkv = (_mm(xb, wqkv_l) + bqkv_l).astype(bf16)        # single bf16 cast
        attn = jnp.zeros((L, D), f32)
        for hh in range(nhead):
            base = hh * 5 * head_dim
            q = qkv[:, base:base + head_dim]                 # scaling pre-folded
            k = qkv[:, base + head_dim:base + 2 * head_dim]
            v = qkv[:, base + 2 * head_dim:base + 3 * head_dim]
            qs = qkv[:, base + 3 * head_dim:base + 4 * head_dim]
            ks = qkv[:, base + 4 * head_dim:base + 5 * head_dim]
            w_inter = _mm_nt(q, k)                           # cross-agent logits
            w_self = _mm_nt(qs, ks)                          # same-agent logits
            logits = jnp.where(same, w_self, w_inter) + amask
            logits = logits - jnp.max(logits, axis=-1, keepdims=True)
            p = jnp.exp(logits)
            p = p * pl.reciprocal(jnp.sum(p, axis=-1, keepdims=True), approx=True)
            # dropout is identity at inference
            pv = _mm(p.astype(bf16), v)                      # (L, hd) f32
            # accumulate through this head's row-block of the output projection
            attn = attn + _mm(pv.astype(bf16), wout_l[hh])   # (L, D) f32
        src = _ln(h + attn + bout_l, n1w_ref[l], n1b_ref[l])
        ff = jnp.maximum(_mm(src.astype(bf16), l1w_ref[l]) + l1b_ref[l], 0.0)
        ff = _mm(ff.astype(bf16), l2w_ref[l]) + l2b_ref[l]
        h = _ln(src + ff, n2w_ref[l], n2b_ref[l])

    ctx_ref[...] = h
    # ---- 'mean' pooling over time: strided VPU sum (no matmul) -----------------
    pool = h[0:num_agent, :]
    for t in range(1, tlen):
        pool = pool + h[t * num_agent:(t + 1) * num_agent, :]
    pool_ref[...] = pool * (1.0 / tlen)


# ----------------------------- parameters / glue -----------------------------

def build_pos_enc(max_len, d_model):
    pe = np.zeros((max_len, d_model), dtype=np.float32)
    position = np.arange(max_len, dtype=np.float32)[:, None]
    div_term = np.exp(np.arange(0, d_model, 2, dtype=np.float32)
                      * (-math.log(10000.0) / d_model))
    pe[:, 0::2] = np.sin(position * div_term)
    pe[:, 1::2] = np.cos(position * div_term)
    return jnp.asarray(pe)


def init_params(key, cfg):
    D, F, H = cfg['model_dim'], cfg['ff_dim'], cfg['nhead']
    nlayer, in_dim = cfg['nlayer'], cfg['in_dim']
    hd = D // H
    keys = jax.random.split(key, 1 + nlayer)
    k1, k2 = jax.random.split(keys[0])
    params = {
        'input_fc_w': 0.1 * jax.random.normal(k1, (in_dim, D), jnp.float32),
        'input_fc_b': 0.1 * jax.random.normal(k2, (1, D), jnp.float32),
        'layers': [],
    }
    for l in range(nlayer):
        ks = jax.random.split(keys[1 + l], 10)
        params['layers'].append({
            'ipw': 0.1 * jax.random.normal(ks[0], (3 * H, D, hd), jnp.float32),
            'ipb': 0.1 * jax.random.normal(ks[1], (3 * H, 1, hd), jnp.float32),
            'spw': 0.1 * jax.random.normal(ks[2], (2 * H, D, hd), jnp.float32),
            'spb': 0.1 * jax.random.normal(ks[3], (2 * H, 1, hd), jnp.float32),
            'outw': 0.1 * jax.random.normal(ks[4], (H, hd, D), jnp.float32),
            'outb': 0.1 * jax.random.normal(ks[5], (1, D), jnp.float32),
            'l1w': 0.1 * jax.random.normal(ks[6], (D, F), jnp.float32),
            'l1b': 0.1 * jax.random.normal(ks[7], (1, F), jnp.float32),
            'l2w': 0.1 * jax.random.normal(ks[8], (F, D), jnp.float32),
            'l2b': 0.1 * jax.random.normal(ks[9], (1, D), jnp.float32),
            'n1w': jnp.ones((1, D), jnp.float32),
            'n1b': jnp.zeros((1, D), jnp.float32),
            'n2w': jnp.ones((1, D), jnp.float32),
            'n2b': jnp.zeros((1, D), jnp.float32),
        })
    return params


def fuse_params(params, nhead):
    """Build lane-dense fused / layer-stacked weights for the kernel.

    * columns packed per head as [q | k | v | q_self | k_self]
    * the 1/sqrt(hd) attention scaling is folded into the q / q_self columns
      (weights AND biases) so no per-head scaling happens in-kernel
    * matmul weights are bf16 (MXU-native, f32 accumulation); biases / LN f32
    """
    bf16 = jnp.bfloat16
    H = nhead
    wqkv, bqkv, wout = [], [], []
    for lp in params['layers']:
        hd = lp['ipw'].shape[-1]
        scaling = hd ** -0.5
        wcols, bcols, wo = [], [], []
        for h in range(H):
            wcols += [lp['ipw'][h] * scaling, lp['ipw'][H + h], lp['ipw'][2 * H + h],
                      lp['spw'][h] * scaling, lp['spw'][H + h]]
            bcols += [lp['ipb'][h] * scaling, lp['ipb'][H + h], lp['ipb'][2 * H + h],
                      lp['spb'][h] * scaling, lp['spb'][H + h]]
            wo.append(lp['outw'][h])                       # (hd, D)
        wqkv.append(jnp.concatenate(wcols, axis=-1))       # (D, 5D)
        bqkv.append(jnp.concatenate(bcols, axis=-1))       # (1, 5D)
        wout.append(jnp.stack(wo, axis=0))                 # (H, hd, D)

    ls = params['layers']
    return {
        'wfc': params['input_fc_w'].astype(bf16),
        'bfc': params['input_fc_b'],
        'wqkv': jnp.stack(wqkv).astype(bf16),              # (nl, D, 5D)
        'bqkv': jnp.stack(bqkv),                           # (nl, 1, 5D)
        'wout': jnp.stack(wout).astype(bf16),              # (nl, H, hd, D)
        'bout': jnp.stack([lp['outb'] for lp in ls]),
        'l1w': jnp.stack([lp['l1w'] for lp in ls]).astype(bf16),
        'l1b': jnp.stack([lp['l1b'] for lp in ls]),
        'l2w': jnp.stack([lp['l2w'] for lp in ls]).astype(bf16),
        'l2b': jnp.stack([lp['l2b'] for lp in ls]),
        'n1w': jnp.stack([lp['n1w'] for lp in ls]),
        'n1b': jnp.stack([lp['n1b'] for lp in ls]),
        'n2w': jnp.stack([lp['n2w'] for lp in ls]),
        'n2b': jnp.stack([lp['n2b'] for lp in ls]),
    }


def _prepare_inputs(data, cfg):
    """Mirrors the PyTorch forward's input_type loop + pos-enc table."""
    # TODO(synk): 'heading' / 'map' input types and vel_heading rotation are not
    # implemented (unused in the default AgentFormer context-encoder config).
    T, N = data['pre_motion'].shape[0], int(data['agent_num'])
    D = cfg['model_dim']
    traj_in = []
    for key in cfg['input_type']:
        if key == 'pos':
            traj_in.append(data['pre_motion'])
        elif key == 'vel':
            vel = data['pre_vel']
            if len(cfg['input_type']) > 1:
                vel = jnp.concatenate([vel[:1], vel], axis=0)
            traj_in.append(vel)                    # vel_heading=False -> no rotation
        elif key == 'norm':
            traj_in.append(data['pre_motion_norm'])
        elif key == 'scene_norm':
            traj_in.append(data['pre_motion_scene_norm'])
        else:
            raise ValueError('unknown input_type!')
    traj_in = jnp.concatenate(traj_in, axis=-1)    # (T, N, in_dim)
    L = T * N
    x = traj_in.reshape(L, traj_in.shape[-1])      # time-major flatten (row = t*N + a)

    pe = build_pos_enc(T, D)
    pe_full = jnp.repeat(pe, N, axis=0)            # repeat_interleave over agents

    aid = np.tile(np.arange(N, dtype=np.int32), T) # agent id of each row
    aid_col = jnp.asarray(aid.reshape(L, 1))
    aid_row = jnp.asarray(aid.reshape(1, L))
    return x, pe_full, aid_col, aid_row, T, N


def context_encoder_forward(params, data, cfg):
    """`data` is one AgentFormer data dict, or a list of them (same T / agent_num).

    Multiple scenes are batched onto a `grid=(B,)` "parallel" axis of a single
    pallas_call (one scene per grid step, fully VMEM-resident).
    """
    single = isinstance(data, dict)
    datas = [data] if single else list(data)

    prepared = [_prepare_inputs(d, cfg) for d in datas]
    _, pe_full, aid_col, aid_row, T, N = prepared[0]
    x_b = jnp.stack([p[0] for p in prepared])                  # (B, L, in_dim)
    amask_b = jnp.stack([d['agent_mask'] for d in datas])      # (B, N, N)

    B = x_b.shape[0]
    D, H, F = cfg['model_dim'], cfg['nhead'], cfg['ff_dim']
    hd = D // H
    L = T * N
    f = fuse_params(params, H)

    kernel = functools.partial(
        context_encoder_kernel,
        nlayer=cfg['nlayer'], nhead=H, head_dim=hd, num_agent=N, tlen=T)

    def batch_spec(shape):                         # leading batch dim squeezed
        nd = len(shape)
        return pl.BlockSpec((None,) + tuple(shape[1:]),
                            lambda b, _nd=nd: (b,) + (0,) * (_nd - 1))

    def shared_spec(shape):                        # full-extent, shared across grid
        nd = len(shape)
        return pl.BlockSpec(tuple(shape), lambda b, _nd=nd: (0,) * _nd)

    weight_keys = ('wfc', 'bfc', 'wqkv', 'bqkv', 'wout', 'bout',
                   'l1w', 'l1b', 'l2w', 'l2b', 'n1w', 'n1b', 'n2w', 'n2b')
    args = (x_b, pe_full, aid_col, aid_row, amask_b) + tuple(f[k] for k in weight_keys)
    in_specs = ([batch_spec(x_b.shape), shared_spec(pe_full.shape),
                 shared_spec(aid_col.shape), shared_spec(aid_row.shape),
                 batch_spec(amask_b.shape)]
                + [shared_spec(f[k].shape) for k in weight_keys])

    # VMEM hint sized to the per-step live set (with headroom), clamped to the
    # v7x physical 64 MiB so the same params work across v5e / v6e / v7x.
    est = (6 * L * L + 12 * L * D + 2 * L * F + 5 * L * D) * 4
    est += sum(int(np.prod(f[k].shape)) * 4 for k in weight_keys)
    vmem_limit = int(min(64 * 1024 * 1024, max(32 * 1024 * 1024, 2 * est)))

    context_enc, agent_context = pl.pallas_call(
        kernel,
        grid=(B,),
        out_shape=(jax.ShapeDtypeStruct((B, L, D), jnp.float32),
                   jax.ShapeDtypeStruct((B, N, D), jnp.float32)),
        in_specs=in_specs,
        out_specs=(batch_spec((B, L, D)), batch_spec((B, N, D))),
        compiler_params=pltpu.CompilerParams(
            dimension_semantics=("parallel",),
            vmem_limit_bytes=vmem_limit),
    )(*args)
    # TODO(synk): pack pooled outputs lane-dense (last dim multiple of 128) for
    # large batches to avoid masked partial stores.

    if single:
        return context_enc[0], agent_context[0]
    return context_enc, agent_context


# ----------------------------- plain-JAX reference -----------------------------

def reference_forward(params, data, cfg):
    x, pe_full, _, _, T, N = _prepare_inputs(data, cfg)
    D, H = cfg['model_dim'], cfg['nhead']
    hd = D // H
    attn_mask = jnp.tile(data['agent_mask'], (T, T))
    same_agent = jnp.tile(jnp.eye(N, dtype=jnp.float32), (T, T))
    out = x @ params['input_fc_w'] + params['input_fc_b'] + pe_full
    scaling = hd ** -0.5
    for lp in params['layers']:
        xl = out
        attn = jnp.zeros_like(xl)
        for h in range(H):
            q = (xl @ lp['ipw'][h] + lp['ipb'][h]) * scaling
            k = xl @ lp['ipw'][H + h] + lp['ipb'][H + h]
            v = xl @ lp['ipw'][2 * H + h] + lp['ipb'][2 * H + h]
            qs = (xl @ lp['spw'][h] + lp['spb'][h]) * scaling
            ks = xl @ lp['spw'][H + h] + lp['spb'][H + h]
            logits = (q @ k.T) * (1.0 - same_agent) + (qs @ ks.T) * same_agent + attn_mask
            p = jax.nn.softmax(logits, axis=-1)
            attn = attn + (p @ v) @ lp['outw'][h]
        attn = attn + lp['outb']
        src = _ln(xl + attn, lp['n1w'], lp['n1b'])
        ff = jnp.maximum(src @ lp['l1w'] + lp['l1b'], 0.0) @ lp['l2w'] + lp['l2b']
        out = _ln(src + ff, lp['n2w'], lp['n2b'])
    context_enc = out
    agent_context = jnp.mean(context_enc.reshape(T, N, D), axis=0)
    return context_enc, agent_context


# ----------------------------- main -----------------------------

if __name__ == "__main__":
    cfg = dict(
        motion_dim=2,
        model_dim=32,    # tf_model_dim
        ff_dim=64,       # tf_ff_dim
        nhead=2,         # tf_nhead
        nlayer=2,
        input_type=('scene_norm', 'vel'),
        pooling='mean',
    )
    cfg['in_dim'] = cfg['motion_dim'] * len(cfg['input_type'])
    T, N, B = 8, 4, 2      # history length, agent_num, batched scenes

    key = jax.random.PRNGKey(0)
    k_param, k_data = jax.random.split(key)
    params = init_params(k_param, cfg)

    datas = []
    for kb in jax.random.split(k_data, B):
        pre_motion = jax.random.normal(kb, (T, N, cfg['motion_dim']), jnp.float32)
        pre_vel = pre_motion[1:] - pre_motion[:-1]
        scene_orig = jnp.mean(pre_motion[-1], axis=0)
        datas.append({
            'pre_motion': pre_motion,
            'pre_vel': pre_vel,
            'pre_motion_scene_norm': pre_motion - scene_orig,
            'agent_num': N,
            'agent_mask': jnp.zeros((N, N), jnp.float32),  # additive mask (no masking)
        })

    ctx_b, pool_b = context_encoder_forward(params, datas, cfg)
    jax.block_until_ready((ctx_b, pool_b))

    assert ctx_b.shape == (B, T * N, cfg['model_dim'])
    assert pool_b.shape == (B, N, cfg['model_dim'])
    for b in range(B):
        ref_enc, ref_ctx = reference_forward(params, datas[b], cfg)
        assert jnp.allclose(ctx_b[b], ref_enc, atol=2e-2, rtol=2e-2)
        assert jnp.allclose(pool_b[b], ref_ctx, atol=2e-2, rtol=2e-2)

    # single-scene path (original module semantics) also works
    ctx1, pool1 = context_encoder_forward(params, datas[0], cfg)
    jax.block_until_ready((ctx1, pool1))
    assert jnp.allclose(ctx1, ctx_b[0], atol=1e-5, rtol=1e-5)

    print("KERNEL_OK")
</pallas_src>

<mosaic_0001>
module attributes {stable_mosaic.version = 11 : i64} {
  func.func @context_encoder_kernel(%arg0: i32, %arg1: memref<1x32x4xf32, #tpu.memory_space<vmem>>, %arg2: memref<32x32xf32, #tpu.memory_space<vmem>>, %arg3: memref<32x1xi32, #tpu.memory_space<vmem>>, %arg4: memref<1x32xi32, #tpu.memory_space<vmem>>, %arg5: memref<1x4x4xf32, #tpu.memory_space<vmem>>, %arg6: memref<4x32xbf16, #tpu.memory_space<vmem>>, %arg7: memref<1x32xf32, #tpu.memory_space<vmem>>, %arg8: memref<2x32x160xbf16, #tpu.memory_space<vmem>>, %arg9: memref<2x1x160xf32, #tpu.memory_space<vmem>>, %arg10: memref<2x2x16x32xbf16, #tpu.memory_space<vmem>>, %arg11: memref<2x1x32xf32, #tpu.memory_space<vmem>>, %arg12: memref<2x32x64xbf16, #tpu.memory_space<vmem>>, %arg13: memref<2x1x64xf32, #tpu.memory_space<vmem>>, %arg14: memref<2x64x32xbf16, #tpu.memory_space<vmem>>, %arg15: memref<2x1x32xf32, #tpu.memory_space<vmem>>, %arg16: memref<2x1x32xf32, #tpu.memory_space<vmem>>, %arg17: memref<2x1x32xf32, #tpu.memory_space<vmem>>, %arg18: memref<2x1x32xf32, #tpu.memory_space<vmem>>, %arg19: memref<2x1x32xf32, #tpu.memory_space<vmem>>, %arg20: memref<1x32x32xf32, #tpu.memory_space<vmem>>, %arg21: memref<1x4x32xf32, #tpu.memory_space<vmem>>) attributes {dimension_semantics = [#tpu.dimension_semantics<parallel>], iteration_bounds = array<i64: 2>, scalar_prefetch = 0 : i64, scratch_operands = 0 : i64, tpu.core_type = #tpu.core_type<tc>, window_params = [{transform_indices = @transform_0, window_bounds = array<i64: 1, 32, 4>}, {pipeline_mode = #tpu.pipeline_mode<synchronous>, transform_indices = @transform_1, window_bounds = array<i64: 32, 32>}, {pipeline_mode = #tpu.pipeline_mode<synchronous>, transform_indices = @transform_2, window_bounds = array<i64: 32, 1>}, {pipeline_mode = #tpu.pipeline_mode<synchronous>, transform_indices = @transform_3, window_bounds = array<i64: 1, 32>}, {transform_indices = @transform_4, window_bounds = array<i64: 1, 4, 4>}, {pipeline_mode = #tpu.pipeline_mode<synchronous>, transform_indices = @transform_5, window_bounds = array<i64: 4, 32>}, {pipeline_mode = #tpu.pipeline_mode<synchronous>, transform_indices = @transform_6, window_bounds = array<i64: 1, 32>}, {pipeline_mode = #tpu.pipeline_mode<synchronous>, transform_indices = @transform_7, window_bounds = array<i64: 2, 32, 160>}, {pipeline_mode = #tpu.pipeline_mode<synchronous>, transform_indices = @transform_8, window_bounds = array<i64: 2, 1, 160>}, {pipeline_mode = #tpu.pipeline_mode<synchronous>, transform_indices = @transform_9, window_bounds = array<i64: 2, 2, 16, 32>}, {pipeline_mode = #tpu.pipeline_mode<synchronous>, transform_indices = @transform_10, window_bounds = array<i64: 2, 1, 32>}, {pipeline_mode = #tpu.pipeline_mode<synchronous>, transform_indices = @transform_11, window_bounds = array<i64: 2, 32, 64>}, {pipeline_mode = #tpu.pipeline_mode<synchronous>, transform_indices = @transform_12, window_bounds = array<i64: 2, 1, 64>}, {pipeline_mode = #tpu.pipeline_mode<synchronous>, transform_indices = @transform_13, window_bounds = array<i64: 2, 64, 32>}, {pipeline_mode = #tpu.pipeline_mode<synchronous>, transform_indices = @transform_14, window_bounds = array<i64: 2, 1, 32>}, {pipeline_mode = #tpu.pipeline_mode<synchronous>, transform_indices = @transform_15, window_bounds = array<i64: 2, 1, 32>}, {pipeline_mode = #tpu.pipeline_mode<synchronous>, transform_indices = @transform_16, window_bounds = array<i64: 2, 1, 32>}, {pipeline_mode = #tpu.pipeline_mode<synchronous>, transform_indices = @transform_17, window_bounds = array<i64: 2, 1, 32>}, {pipeline_mode = #tpu.pipeline_mode<synchronous>, transform_indices = @transform_18, window_bounds = array<i64: 2, 1, 32>}, {transform_indices = @transform_19, window_bounds = array<i64: 1, 32, 32>}, {transform_indices = @transform_20, window_bounds = array<i64: 1, 4, 32>}]} {
    %c0 = arith.constant 0 : index
    %c0_0 = arith.constant 0 : index
    %c0_1 = arith.constant 0 : index
    %0 = vector.load %arg1[%c0, %c0_0, %c0_1] : memref<1x32x4xf32, #tpu.memory_space<vmem>>, vector<1x32x4xf32>
    %1 = vector.shape_cast %0 : vector<1x32x4xf32> to vector<32x4xf32>
    %2 = arith.truncf %1 : vector<32x4xf32> to vector<32x4xbf16>
    %c0_2 = arith.constant 0 : index
    %c0_3 = arith.constant 0 : index
    %3 = vector.load %arg6[%c0_2, %c0_3] : memref<4x32xbf16, #tpu.memory_space<vmem>>, vector<4x32xbf16>
    %cst = arith.constant dense<0.000000e+00> : vector<32x32xf32>
    %4 = tpu.matmul %2, %3, %cst {dimension_numbers = #tpu.dot_dimension_numbers<[1], [0], [0], [1], [0, 0, 1, 1], [], []>} : vector<32x4xbf16>, vector<4x32xbf16>, vector<32x32xf32> -> vector<32x32xf32>
    %c0_4 = arith.constant 0 : index
    %c0_5 = arith.constant 0 : index
    %5 = vector.load %arg7[%c0_4, %c0_5] : memref<1x32xf32, #tpu.memory_space<vmem>>, vector<1x32xf32>
    %6 = vector.broadcast %5 : vector<1x32xf32> to vector<32x32xf32>
    %7 = arith.addf %4, %6 : vector<32x32xf32>
    %c0_6 = arith.constant 0 : index
    %c0_7 = arith.constant 0 : index
    %8 = vector.load %arg2[%c0_6, %c0_7] : memref<32x32xf32, #tpu.memory_space<vmem>>, vector<32x32xf32>
    %9 = arith.addf %7, %8 : vector<32x32xf32>
    %c0_8 = arith.constant 0 : index
    %c0_9 = arith.constant 0 : index
    %10 = vector.load %arg3[%c0_8, %c0_9] : memref<32x1xi32, #tpu.memory_space<vmem>>, vector<32x1xi32>
    %c0_10 = arith.constant 0 : index
    %c0_11 = arith.constant 0 : index
    %11 = vector.load %arg4[%c0_10, %c0_11] : memref<1x32xi32, #tpu.memory_space<vmem>>, vector<1x32xi32>
    %12 = vector.broadcast %10 : vector<32x1xi32> to vector<32x32xi32>
    %13 = vector.broadcast %11 : vector<1x32xi32> to vector<32x32xi32>
    %14 = arith.cmpi eq, %12, %13 : vector<32x32xi32>
    %15 = tpu.iota {dimensions = array<i32: 1>} : vector<32x4xi32>
    %16 = tpu.iota {dimensions = array<i32: 0>} : vector<4x32xi32>
    %17 = vector.broadcast %10 : vector<32x1xi32> to vector<32x4xi32>
    %18 = arith.cmpi eq, %15, %17 : vector<32x4xi32>
    %19 = arith.extui %18 : vector<32x4xi1> to vector<32x4xi32>
    %20 = arith.sitofp %19 : vector<32x4xi32> to vector<32x4xf32>
    %21 = arith.truncf %20 : vector<32x4xf32> to vector<32x4xbf16>
    %22 = vector.broadcast %11 : vector<1x32xi32> to vector<4x32xi32>
    %23 = arith.cmpi eq, %16, %22 : vector<4x32xi32>
    %24 = arith.extui %23 : vector<4x32xi1> to vector<4x32xi32>
    %25 = arith.sitofp %24 : vector<4x32xi32> to vector<4x32xf32>
    %26 = arith.truncf %25 : vector<4x32xf32> to vector<4x32xbf16>
    %c0_12 = arith.constant 0 : index
    %c0_13 = arith.constant 0 : index
    %c0_14 = arith.constant 0 : index
    %27 = vector.load %arg5[%c0_12, %c0_13, %c0_14] : memref<1x4x4xf32, #tpu.memory_space<vmem>>, vector<1x4x4xf32>
    %28 = vector.shape_cast %27 : vector<1x4x4xf32> to vector<4x4xf32>
    %cst_15 = arith.constant -1.000000e+09 : f32
    %29 = vector.broadcast %cst_15 : f32 to vector<4x4xf32>
    %30 = arith.maximumf %28, %29 : vector<4x4xf32>
    %31 = arith.truncf %30 : vector<4x4xf32> to vector<4x4xbf16>
    %cst_16 = arith.constant dense<0.000000e+00> : vector<32x4xf32>
    %32 = tpu.matmul %21, %31, %cst_16 {dimension_numbers = #tpu.dot_dimension_numbers<[1], [0], [0], [1], [0, 0, 1, 1], [], []>} : vector<32x4xbf16>, vector<4x4xbf16>, vector<32x4xf32> -> vector<32x4xf32>
    %33 = arith.truncf %32 : vector<32x4xf32> to vector<32x4xbf16>
    %cst_17 = arith.constant dense<0.000000e+00> : vector<32x32xf32>
    %34 = tpu.matmul %33, %26, %cst_17 {dimension_numbers = #tpu.dot_dimension_numbers<[1], [0], [0], [1], [0, 0, 1, 1], [], []>} : vector<32x4xbf16>, vector<4x32xbf16>, vector<32x32xf32> -> vector<32x32xf32>
    %c0_18 = arith.constant 0 : index
    %c0_19 = arith.constant 0 : index
    %c0_20 = arith.constant 0 : index
    %35 = vector.load %arg8[%c0_18, %c0_19, %c0_20] : memref<2x32x160xbf16, #tpu.memory_space<vmem>>, vector<1x32x160xbf16>
    %36 = vector.shape_cast %35 : vector<1x32x160xbf16> to vector<32x160xbf16>
    %c0_21 = arith.constant 0 : index
    %c0_22 = arith.constant 0 : index
    %c0_23 = arith.constant 0 : index
    %37 = vector.load %arg9[%c0_21, %c0_22, %c0_23] : memref<2x1x160xf32, #tpu.memory_space<vmem>>, vector<1x1x160xf32>
    %38 = vector.shape_cast %37 : vector<1x1x160xf32> to vector<1x160xf32>
    %c0_24 = arith.constant 0 : index
    %c0_25 = arith.constant 0 : index
    %c0_26 = arith.constant 0 : index
    %c0_27 = arith.constant 0 : index
    %39 = vector.load %arg10[%c0_24, %c0_25, %c0_26, %c0_27] : memref<2x2x16x32xbf16, #tpu.memory_space<vmem>>, vector<1x2x16x32xbf16>
    %40 = vector.shape_cast %39 : vector<1x2x16x32xbf16> to vector<2x16x32xbf16>
    %c0_28 = arith.constant 0 : index
    %c0_29 = arith.constant 0 : index
    %c0_30 = arith.constant 0 : index
    %41 = vector.load %arg11[%c0_28, %c0_29, %c0_30] : memref<2x1x32xf32, #tpu.memory_space<vmem>>, vector<1x1x32xf32>
    %42 = vector.shape_cast %41 : vector<1x1x32xf32> to vector<1x32xf32>
    %43 = arith.truncf %9 : vector<32x32xf32> to vector<32x32xbf16>
    %cst_31 = arith.constant dense<0.000000e+00> : vector<32x160xf32>
    %44 = tpu.matmul %43, %36, %cst_31 {dimension_numbers = #tpu.dot_dimension_numbers<[1], [0], [0], [1], [0, 0, 1, 1], [], []>} : vector<32x32xbf16>, vector<32x160xbf16>, vector<32x160xf32> -> vector<32x160xf32>
    %45 = vector.broadcast %38 : vector<1x160xf32> to vector<32x160xf32>
    %46 = arith.addf %44, %45 : vector<32x160xf32>
    %47 = arith.truncf %46 : vector<32x160xf32> to vector<32x160xbf16>
    %cst_32 = arith.constant 0.000000e+00 : f32
    %48 = vector.broadcast %cst_32 : f32 to vector<32x32xf32>
    %49 = vector.extract_strided_slice %47 {offsets = [0, 0], sizes = [32, 16], strides = [1, 1]} : vector<32x160xbf16> to vector<32x16xbf16>
    %50 = vector.extract_strided_slice %47 {offsets = [0, 16], sizes = [32, 16], strides = [1, 1]} : vector<32x160xbf16> to vector<32x16xbf16>
    %51 = vector.extract_strided_slice %47 {offsets = [0, 32], sizes = [32, 16], strides = [1, 1]} : vector<32x160xbf16> to vector<32x16xbf16>
    %52 = vector.extract_strided_slice %47 {offsets = [0, 48], sizes = [32, 16], strides = [1, 1]} : vector<32x160xbf16> to vector<32x16xbf16>
    %53 = vector.extract_strided_slice %47 {offsets = [0, 64], sizes = [32, 16], strides = [1, 1]} : vector<32x160xbf16> to vector<32x16xbf16>
    %cst_33 = arith.constant dense<0.000000e+00> : vector<32x32xf32>
    %54 = tpu.matmul %49, %50, %cst_33 {dimension_numbers = #tpu.dot_dimension_numbers<[1], [1], [0], [0], [0, 0, 1, 0], [], []>} : vector<32x16xbf16>, vector<32x16xbf16>, vector<32x32xf32> -> vector<32x32xf32>
    %cst_34 = arith.constant dense<0.000000e+00> : vector<32x32xf32>
    %55 = tpu.matmul %52, %53, %cst_34 {dimension_numbers = #tpu.dot_dimension_numbers<[1], [1], [0], [0], [0, 0, 1, 0], [], []>} : vector<32x16xbf16>, vector<32x16xbf16>, vector<32x32xf32> -> vector<32x32xf32>
    %56 = arith.select %14, %55, %54 : vector<32x32xi1>, vector<32x32xf32>
    %57 = arith.addf %56, %34 : vector<32x32xf32>
    %cst_35 = arith.constant dense<0xFF800000> : vector<32xf32>
    %58 = vector.multi_reduction <maximumf>, %57, %cst_35 [1] : vector<32x32xf32> to vector<32xf32>
    %59 = vector.shape_cast %58 : vector<32xf32> to vector<32x1xf32>
    %60 = vector.broadcast %59 : vector<32x1xf32> to vector<32x32xf32>
    %61 = arith.subf %57, %60 : vector<32x32xf32>
    %62 = math.exp %61 : vector<32x32xf32>
    %cst_36 = arith.constant dense<0.000000e+00> : vector<32xf32>
    %63 = vector.multi_reduction <add>, %62, %cst_36 [1] : vector<32x32xf32> to vector<32xf32>
    %64 = vector.shape_cast %63 : vector<32xf32> to vector<32x1xf32>
    %65 = tpu.reciprocal %64 {approx = true} : vector<32x1xf32> -> vector<32x1xf32>
    %66 = vector.broadcast %65 : vector<32x1xf32> to vector<32x32xf32>
    %67 = arith.mulf %62, %66 : vector<32x32xf32>
    %68 = arith.truncf %67 : vector<32x32xf32> to vector<32x32xbf16>
    %cst_37 = arith.constant dense<0.000000e+00> : vector<32x16xf32>
    %69 = tpu.matmul %68, %51, %cst_37 {dimension_numbers = #tpu.dot_dimension_numbers<[1], [0], [0], [1], [0, 0, 1, 1], [], []>} : vector<32x32xbf16>, vector<32x16xbf16>, vector<32x16xf32> -> vector<32x16xf32>
    %70 = arith.truncf %69 : vector<32x16xf32> to vector<32x16xbf16>
    %71 = vector.extract_strided_slice %40 {offsets = [0, 0, 0], sizes = [1, 16, 32], strides = [1, 1, 1]} : vector<2x16x32xbf16> to vector<1x16x32xbf16>
    %72 = vector.shape_cast %71 : vector<1x16x32xbf16> to vector<16x32xbf16>
    %cst_38 = arith.constant dense<0.000000e+00> : vector<32x32xf32>
    %73 = tpu.matmul %70, %72, %cst_38 {dimension_numbers = #tpu.dot_dimension_numbers<[1], [0], [0], [1], [0, 0, 1, 1], [], []>} : vector<32x16xbf16>, vector<16x32xbf16>, vector<32x32xf32> -> vector<32x32xf32>
    %74 = arith.addf %48, %73 : vector<32x32xf32>
    %75 = vector.extract_strided_slice %47 {offsets = [0, 80], sizes = [32, 16], strides = [1, 1]} : vector<32x160xbf16> to vector<32x16xbf16>
    %76 = vector.extract_strided_slice %47 {offsets = [0, 96], sizes = [32, 16], strides = [1, 1]} : vector<32x160xbf16> to vector<32x16xbf16>
    %77 = vector.extract_strided_slice %47 {offsets = [0, 112], sizes = [32, 16], strides = [1, 1]} : vector<32x160xbf16> to vector<32x16xbf16>
    %78 = vector.extract_strided_slice %47 {offsets = [0, 128], sizes = [32, 16], strides = [1, 1]} : vector<32x160xbf16> to vector<32x16xbf16>
    %79 = vector.extract_strided_slice %47 {offsets = [0, 144], sizes = [32, 16], strides = [1, 1]} : vector<32x160xbf16> to vector<32x16xbf16>
    %cst_39 = arith.constant dense<0.000000e+00> : vector<32x32xf32>
    %80 = tpu.matmul %75, %76, %cst_39 {dimension_numbers = #tpu.dot_dimension_numbers<[1], [1], [0], [0], [0, 0, 1, 0], [], []>} : vector<32x16xbf16>, vector<32x16xbf16>, vector<32x32xf32> -> vector<32x32xf32>
    %cst_40 = arith.constant dense<0.000000e+00> : vector<32x32xf32>
    %81 = tpu.matmul %78, %79, %cst_40 {dimension_numbers = #tpu.dot_dimension_numbers<[1], [1], [0], [0], [0, 0, 1, 0], [], []>} : vector<32x16xbf16>, vector<32x16xbf16>, vector<32x32xf32> -> vector<32x32xf32>
    %82 = arith.select %14, %81, %80 : vector<32x32xi1>, vector<32x32xf32>
    %83 = arith.addf %82, %34 : vector<32x32xf32>
    %cst_41 = arith.constant dense<0xFF800000> : vector<32xf32>
    %84 = vector.multi_reduction <maximumf>, %83, %cst_41 [1] : vector<32x32xf32> to vector<32xf32>
    %85 = vector.shape_cast %84 : vector<32xf32> to vector<32x1xf32>
    %86 = vector.broadcast %85 : vector<32x1xf32> to vector<32x32xf32>
    %87 = arith.subf %83, %86 : vector<32x32xf32>
    %88 = math.exp %87 : vector<32x32xf32>
    %cst_42 = arith.constant dense<0.000000e+00> : vector<32xf32>
    %89 = vector.multi_reduction <add>, %88, %cst_42 [1] : vector<32x32xf32> to vector<32xf32>
    %90 = vector.shape_cast %89 : vector<32xf32> to vector<32x1xf32>
    %91 = tpu.reciprocal %90 {approx = true} : vector<32x1xf32> -> vector<32x1xf32>
    %92 = vector.broadcast %91 : vector<32x1xf32> to vector<32x32xf32>
    %93 = arith.mulf %88, %92 : vector<32x32xf32>
    %94 = arith.truncf %93 : vector<32x32xf32> to vector<32x32xbf16>
    %cst_43 = arith.constant dense<0.000000e+00> : vector<32x16xf32>
    %95 = tpu.matmul %94, %77, %cst_43 {dimension_numbers = #tpu.dot_dimension_numbers<[1], [0], [0], [1], [0, 0, 1, 1], [], []>} : vector<32x32xbf16>, vector<32x16xbf16>, vector<32x16xf32> -> vector<32x16xf32>
    %96 = arith.truncf %95 : vector<32x16xf32> to vector<32x16xbf16>
    %97 = vector.extract_strided_slice %40 {offsets = [1, 0, 0], sizes = [1, 16, 32], strides = [1, 1, 1]} : vector<2x16x32xbf16> to vector<1x16x32xbf16>
    %98 = vector.shape_cast %97 : vector<1x16x32xbf16> to vector<16x32xbf16>
    %cst_44 = arith.constant dense<0.000000e+00> : vector<32x32xf32>
    %99 = tpu.matmul %96, %98, %cst_44 {dimension_numbers = #tpu.dot_dimension_numbers<[1], [0], [0], [1], [0, 0, 1, 1], [], []>} : vector<32x16xbf16>, vector<16x32xbf16>, vector<32x32xf32> -> vector<32x32xf32>
    %100 = arith.addf %74, %99 : vector<32x32xf32>
    %101 = arith.addf %9, %100 : vector<32x32xf32>
    %102 = vector.broadcast %42 : vector<1x32xf32> to vector<32x32xf32>
    %103 = arith.addf %101, %102 : vector<32x32xf32>
    %c0_45 = arith.constant 0 : index
    %c0_46 = arith.constant 0 : index
    %c0_47 = arith.constant 0 : index
    %104 = vector.load %arg16[%c0_45, %c0_46, %c0_47] : memref<2x1x32xf32, #tpu.memory_space<vmem>>, vector<1x1x32xf32>
    %105 = vector.shape_cast %104 : vector<1x1x32xf32> to vector<1x32xf32>
    %c0_48 = arith.constant 0 : index
    %c0_49 = arith.constant 0 : index
    %c0_50 = arith.constant 0 : index
    %106 = vector.load %arg17[%c0_48, %c0_49, %c0_50] : memref<2x1x32xf32, #tpu.memory_space<vmem>>, vector<1x1x32xf32>
    %107 = vector.shape_cast %106 : vector<1x1x32xf32> to vector<1x32xf32>
    %cst_51 = arith.constant dense<0.000000e+00> : vector<32xf32>
    %108 = vector.multi_reduction <add>, %103, %cst_51 [1] : vector<32x32xf32> to vector<32xf32>
    %109 = vector.shape_cast %108 : vector<32xf32> to vector<32x1xf32>
    %cst_52 = arith.constant 3.200000e+01 : f32
    %110 = vector.broadcast %cst_52 : f32 to vector<32x1xf32>
    %111 = arith.divf %109, %110 : vector<32x1xf32>
    %112 = vector.broadcast %111 : vector<32x1xf32> to vector<32x32xf32>
    %113 = arith.subf %103, %112 : vector<32x32xf32>
    %114 = arith.mulf %113, %113 : vector<32x32xf32>
    %cst_53 = arith.constant dense<0.000000e+00> : vector<32xf32>
    %115 = vector.multi_reduction <add>, %114, %cst_53 [1] : vector<32x32xf32> to vector<32xf32>
    %116 = vector.shape_cast %115 : vector<32xf32> to vector<32x1xf32>
    %cst_54 = arith.constant 3.200000e+01 : f32
    %117 = vector.broadcast %cst_54 : f32 to vector<32x1xf32>
    %118 = arith.divf %116, %117 : vector<32x1xf32>
    %119 = vector.broadcast %111 : vector<32x1xf32> to vector<32x32xf32>
    %120 = arith.subf %103, %119 : vector<32x32xf32>
    %cst_55 = arith.constant 9.99999974E-6 : f32
    %121 = vector.broadcast %cst_55 : f32 to vector<32x1xf32>
    %122 = arith.addf %118, %121 : vector<32x1xf32>
    %123 = math.rsqrt %122 : vector<32x1xf32>
    %124 = vector.broadcast %123 : vector<32x1xf32> to vector<32x32xf32>
    %125 = arith.mulf %120, %124 : vector<32x32xf32>
    %126 = vector.broadcast %105 : vector<1x32xf32> to vector<32x32xf32>
    %127 = arith.mulf %125, %126 : vector<32x32xf32>
    %128 = vector.broadcast %107 : vector<1x32xf32> to vector<32x32xf32>
    %129 = arith.addf %127, %128 : vector<32x32xf32>
    %130 = arith.truncf %129 : vector<32x32xf32> to vector<32x32xbf16>
    %c0_56 = arith.constant 0 : index
    %c0_57 = arith.constant 0 : index
    %c0_58 = arith.constant 0 : index
    %131 = vector.load %arg12[%c0_56, %c0_57, %c0_58] : memref<2x32x64xbf16, #tpu.memory_space<vmem>>, vector<1x32x64xbf16>
    %132 = vector.shape_cast %131 : vector<1x32x64xbf16> to vector<32x64xbf16>
    %cst_59 = arith.constant dense<0.000000e+00> : vector<32x64xf32>
    %133 = tpu.matmul %130, %132, %cst_59 {dimension_numbers = #tpu.dot_dimension_numbers<[1], [0], [0], [1], [0, 0, 1, 1], [], []>} : vector<32x32xbf16>, vector<32x64xbf16>, vector<32x64xf32> -> vector<32x64xf32>
    %c0_60 = arith.constant 0 : index
    %c0_61 = arith.constant 0 : index
    %c0_62 = arith.constant 0 : index
    %134 = vector.load %arg13[%c0_60, %c0_61, %c0_62] : memref<2x1x64xf32, #tpu.memory_space<vmem>>, vector<1x1x64xf32>
    %135 = vector.shape_cast %134 : vector<1x1x64xf32> to vector<1x64xf32>
    %136 = vector.broadcast %135 : vector<1x64xf32> to vector<32x64xf32>
    %137 = arith.addf %133, %136 : vector<32x64xf32>
    %cst_63 = arith.constant 0.000000e+00 : f32
    %138 = vector.broadcast %cst_63 : f32 to vector<32x64xf32>
    %139 = arith.maximumf %137, %138 : vector<32x64xf32>
    %140 = arith.truncf %139 : vector<32x64xf32> to vector<32x64xbf16>
    %c0_64 = arith.constant 0 : index
    %c0_65 = arith.constant 0 : index
    %c0_66 = arith.constant 0 : index
    %141 = vector.load %arg14[%c0_64, %c0_65, %c0_66] : memref<2x64x32xbf16, #tpu.memory_space<vmem>>, vector<1x64x32xbf16>
    %142 = vector.shape_cast %141 : vector<1x64x32xbf16> to vector<64x32xbf16>
    %cst_67 = arith.constant dense<0.000000e+00> : vector<32x32xf32>
    %143 = tpu.matmul %140, %142, %cst_67 {dimension_numbers = #tpu.dot_dimension_numbers<[1], [0], [0], [1], [0, 0, 1, 1], [], []>} : vector<32x64xbf16>, vector<64x32xbf16>, vector<32x32xf32> -> vector<32x32xf32>
    %c0_68 = arith.constant 0 : index
    %c0_69 = arith.constant 0 : index
    %c0_70 = arith.constant 0 : index
    %144 = vector.load %arg15[%c0_68, %c0_69, %c0_70] : memref<2x1x32xf32, #tpu.memory_space<vmem>>, vector<1x1x32xf32>
    %145 = vector.shape_cast %144 : vector<1x1x32xf32> to vector<1x32xf32>
    %146 = vector.broadcast %145 : vector<1x32xf32> to vector<32x32xf32>
    %147 = arith.addf %143, %146 : vector<32x32xf32>
    %148 = arith.addf %129, %147 : vector<32x32xf32>
    %c0_71 = arith.constant 0 : index
    %c0_72 = arith.constant 0 : index
    %c0_73 = arith.constant 0 : index
    %149 = vector.load %arg18[%c0_71, %c0_72, %c0_73] : memref<2x1x32xf32, #tpu.memory_space<vmem>>, vector<1x1x32xf32>
    %150 = vector.shape_cast %149 : vector<1x1x32xf32> to vector<1x32xf32>
    %c0_74 = arith.constant 0 : index
    %c0_75 = arith.constant 0 : index
    %c0_76 = arith.constant 0 : index
    %151 = vector.load %arg19[%c0_74, %c0_75, %c0_76] : memref<2x1x32xf32, #tpu.memory_space<vmem>>, vector<1x1x32xf32>
    %152 = vector.shape_cast %151 : vector<1x1x32xf32> to vector<1x32xf32>
    %cst_77 = arith.constant dense<0.000000e+00> : vector<32xf32>
    %153 = vector.multi_reduction <add>, %148, %cst_77 [1] : vector<32x32xf32> to vector<32xf32>
    %154 = vector.shape_cast %153 : vector<32xf32> to vector<32x1xf32>
    %cst_78 = arith.constant 3.200000e+01 : f32
    %155 = vector.broadcast %cst_78 : f32 to vector<32x1xf32>
    %156 = arith.divf %154, %155 : vector<32x1xf32>
    %157 = vector.broadcast %156 : vector<32x1xf32> to vector<32x32xf32>
    %158 = arith.subf %148, %157 : vector<32x32xf32>
    %159 = arith.mulf %158, %158 : vector<32x32xf32>
    %cst_79 = arith.constant dense<0.000000e+00> : vector<32xf32>
    %160 = vector.multi_reduction <add>, %159, %cst_79 [1] : vector<32x32xf32> to vector<32xf32>
    %161 = vector.shape_cast %160 : vector<32xf32> to vector<32x1xf32>
    %cst_80 = arith.constant 3.200000e+01 : f32
    %162 = vector.broadcast %cst_80 : f32 to vector<32x1xf32>
    %163 = arith.divf %161, %162 : vector<32x1xf32>
    %164 = vector.broadcast %156 : vector<32x1xf32> to vector<32x32xf32>
    %165 = arith.subf %148, %164 : vector<32x32xf32>
    %cst_81 = arith.constant 9.99999974E-6 : f32
    %166 = vector.broadcast %cst_81 : f32 to vector<32x1xf32>
    %167 = arith.addf %163, %166 : vector<32x1xf32>
    %168 = math.rsqrt %167 : vector<32x1xf32>
    %169 = vector.broadcast %168 : vector<32x1xf32> to vector<32x32xf32>
    %170 = arith.mulf %165, %169 : vector<32x32xf32>
    %171 = vector.broadcast %150 : vector<1x32xf32> to vector<32x32xf32>
    %172 = arith.mulf %170, %171 : vector<32x32xf32>
    %173 = vector.broadcast %152 : vector<1x32xf32> to vector<32x32xf32>
    %174 = arith.addf %172, %173 : vector<32x32xf32>
    %c1 = arith.constant 1 : index
    %c0_82 = arith.constant 0 : index
    %c0_83 = arith.constant 0 : index
    %175 = vector.load %arg8[%c1, %c0_82, %c0_83] : memref<2x32x160xbf16, #tpu.memory_space<vmem>>, vector<1x32x160xbf16>
    %176 = vector.shape_cast %175 : vector<1x32x160xbf16> to vector<32x160xbf16>
    %c1_84 = arith.constant 1 : index
    %c0_85 = arith.constant 0 : index
    %c0_86 = arith.constant 0 : index
    %177 = vector.load %arg9[%c1_84, %c0_85, %c0_86] : memref<2x1x160xf32, #tpu.memory_space<vmem>>, vector<1x1x160xf32>
    %178 = vector.shape_cast %177 : vector<1x1x160xf32> to vector<1x160xf32>
    %c1_87 = arith.constant 1 : index
    %c0_88 = arith.constant 0 : index
    %c0_89 = arith.constant 0 : index
    %c0_90 = arith.constant 0 : index
    %179 = vector.load %arg10[%c1_87, %c0_88, %c0_89, %c0_90] : memref<2x2x16x32xbf16, #tpu.memory_space<vmem>>, vector<1x2x16x32xbf16>
    %180 = vector.shape_cast %179 : vector<1x2x16x32xbf16> to vector<2x16x32xbf16>
    %c1_91 = arith.constant 1 : index
    %c0_92 = arith.constant 0 : index
    %c0_93 = arith.constant 0 : index
    %181 = vector.load %arg11[%c1_91, %c0_92, %c0_93] : memref<2x1x32xf32, #tpu.memory_space<vmem>>, vector<1x1x32xf32>
    %182 = vector.shape_cast %181 : vector<1x1x32xf32> to vector<1x32xf32>
    %183 = arith.truncf %174 : vector<32x32xf32> to vector<32x32xbf16>
    %cst_94 = arith.constant dense<0.000000e+00> : vector<32x160xf32>
    %184 = tpu.matmul %183, %176, %cst_94 {dimension_numbers = #tpu.dot_dimension_numbers<[1], [0], [0], [1], [0, 0, 1, 1], [], []>} : vector<32x32xbf16>, vector<32x160xbf16>, vector<32x160xf32> -> vector<32x160xf32>
    %185 = vector.broadcast %178 : vector<1x160xf32> to vector<32x160xf32>
    %186 = arith.addf %184, %185 : vector<32x160xf32>
    %187 = arith.truncf %186 : vector<32x160xf32> to vector<32x160xbf16>
    %cst_95 = arith.constant 0.000000e+00 : f32
    %188 = vector.broadcast %cst_95 : f32 to vector<32x32xf32>
    %189 = vector.extract_strided_slice %187 {offsets = [0, 0], sizes = [32, 16], strides = [1, 1]} : vector<32x160xbf16> to vector<32x16xbf16>
    %190 = vector.extract_strided_slice %187 {offsets = [0, 16], sizes = [32, 16], strides = [1, 1]} : vector<32x160xbf16> to vector<32x16xbf16>
    %191 = vector.extract_strided_slice %187 {offsets = [0, 32], sizes = [32, 16], strides = [1, 1]} : vector<32x160xbf16> to vector<32x16xbf16>
    %192 = vector.extract_strided_slice %187 {offsets = [0, 48], sizes = [32, 16], strides = [1, 1]} : vector<32x160xbf16> to vector<32x16xbf16>
    %193 = vector.extract_strided_slice %187 {offsets = [0, 64], sizes = [32, 16], strides = [1, 1]} : vector<32x160xbf16> to vector<32x16xbf16>
    %cst_96 = arith.constant dense<0.000000e+00> : vector<32x32xf32>
    %194 = tpu.matmul %189, %190, %cst_96 {dimension_numbers = #tpu.dot_dimension_numbers<[1], [1], [0], [0], [0, 0, 1, 0], [], []>} : vector<32x16xbf16>, vector<32x16xbf16>, vector<32x32xf32> -> vector<32x32xf32>
    %cst_97 = arith.constant dense<0.000000e+00> : vector<32x32xf32>
    %195 = tpu.matmul %192, %193, %cst_97 {dimension_numbers = #tpu.dot_dimension_numbers<[1], [1], [0], [0], [0, 0, 1, 0], [], []>} : vector<32x16xbf16>, vector<32x16xbf16>, vector<32x32xf32> -> vector<32x32xf32>
    %196 = arith.select %14, %195, %194 : vector<32x32xi1>, vector<32x32xf32>
    %197 = arith.addf %196, %34 : vector<32x32xf32>
    %cst_98 = arith.constant dense<0xFF800000> : vector<32xf32>
    %198 = vector.multi_reduction <maximumf>, %197, %cst_98 [1] : vector<32x32xf32> to vector<32xf32>
    %199 = vector.shape_cast %198 : vector<32xf32> to vector<32x1xf32>
    %200 = vector.broadcast %199 : vector<32x1xf32> to vector<32x32xf32>
    %201 = arith.subf %197, %200 : vector<32x32xf32>
    %202 = math.exp %201 : vector<32x32xf32>
    %cst_99 = arith.constant dense<0.000000e+00> : vector<32xf32>
    %203 = vector.multi_reduction <add>, %202, %cst_99 [1] : vector<32x32xf32> to vector<32xf32>
    %204 = vector.shape_cast %203 : vector<32xf32> to vector<32x1xf32>
    %205 = tpu.reciprocal %204 {approx = true} : vector<32x1xf32> -> vector<32x1xf32>
    %206 = vector.broadcast %205 : vector<32x1xf32> to vector<32x32xf32>
    %207 = arith.mulf %202, %206 : vector<32x32xf32>
    %208 = arith.truncf %207 : vector<32x32xf32> to vector<32x32xbf16>
    %cst_100 = arith.constant dense<0.000000e+00> : vector<32x16xf32>
    %209 = tpu.matmul %208, %191, %cst_100 {dimension_numbers = #tpu.dot_dimension_numbers<[1], [0], [0], [1], [0, 0, 1, 1], [], []>} : vector<32x32xbf16>, vector<32x16xbf16>, vector<32x16xf32> -> vector<32x16xf32>
    %210 = arith.truncf %209 : vector<32x16xf32> to vector<32x16xbf16>
    %211 = vector.extract_strided_slice %180 {offsets = [0, 0, 0], sizes = [1, 16, 32], strides = [1, 1, 1]} : vector<2x16x32xbf16> to vector<1x16x32xbf16>
    %212 = vector.shape_cast %211 : vector<1x16x32xbf16> to vector<16x32xbf16>
    %cst_101 = arith.constant dense<0.000000e+00> : vector<32x32xf32>
    %213 = tpu.matmul %210, %212, %cst_101 {dimension_numbers = #tpu.dot_dimension_numbers<[1], [0], [0], [1], [0, 0, 1, 1], [], []>} : vector<32x16xbf16>, vector<16x32xbf16>, vector<32x32xf32> -> vector<32x32xf32>
    %214 = arith.addf %188, %213 : vector<32x32xf32>
    %215 = vector.extract_strided_slice %187 {offsets = [0, 80], sizes = [32, 16], strides = [1, 1]} : vector<32x160xbf16> to vector<32x16xbf16>
    %216 = vector.extract_strided_slice %187 {offsets = [0, 96], sizes = [32, 16], strides = [1, 1]} : vector<32x160xbf16> to vector<32x16xbf16>
    %217 = vector.extract_strided_slice %187 {offsets = [0, 112], sizes = [32, 16], strides = [1, 1]} : vector<32x160xbf16> to vector<32x16xbf16>
    %218 = vector.extract_strided_slice %187 {offsets = [0, 128], sizes = [32, 16], strides = [1, 1]} : vector<32x160xbf16> to vector<32x16xbf16>
    %219 = vector.extract_strided_slice %187 {offsets = [0, 144], sizes = [32, 16], strides = [1, 1]} : vector<32x160xbf16> to vector<32x16xbf16>
    %cst_102 = arith.constant dense<0.000000e+00> : vector<32x32xf32>
    %220 = tpu.matmul %215, %216, %cst_102 {dimension_numbers = #tpu.dot_dimension_numbers<[1], [1], [0], [0], [0, 0, 1, 0], [], []>} : vector<32x16xbf16>, vector<32x16xbf16>, vector<32x32xf32> -> vector<32x32xf32>
    %cst_103 = arith.constant dense<0.000000e+00> : vector<32x32xf32>
    %221 = tpu.matmul %218, %219, %cst_103 {dimension_numbers = #tpu.dot_dimension_numbers<[1], [1], [0], [0], [0, 0, 1, 0], [], []>} : vector<32x16xbf16>, vector<32x16xbf16>, vector<32x32xf32> -> vector<32x32xf32>
    %222 = arith.select %14, %221, %220 : vector<32x32xi1>, vector<32x32xf32>
    %223 = arith.addf %222, %34 : vector<32x32xf32>
    %cst_104 = arith.constant dense<0xFF800000> : vector<32xf32>
    %224 = vector.multi_reduction <maximumf>, %223, %cst_104 [1] : vector<32x32xf32> to vector<32xf32>
    %225 = vector.shape_cast %224 : vector<32xf32> to vector<32x1xf32>
    %226 = vector.broadcast %225 : vector<32x1xf32> to vector<32x32xf32>
    %227 = arith.subf %223, %226 : vector<32x32xf32>
    %228 = math.exp %227 : vector<32x32xf32>
    %cst_105 = arith.constant dense<0.000000e+00> : vector<32xf32>
    %229 = vector.multi_reduction <add>, %228, %cst_105 [1] : vector<32x32xf32> to vector<32xf32>
    %230 = vector.shape_cast %229 : vector<32xf32> to vector<32x1xf32>
    %231 = tpu.reciprocal %230 {approx = true} : vector<32x1xf32> -> vector<32x1xf32>
    %232 = vector.broadcast %231 : vector<32x1xf32> to vector<32x32xf32>
    %233 = arith.mulf %228, %232 : vector<32x32xf32>
    %234 = arith.truncf %233 : vector<32x32xf32> to vector<32x32xbf16>
    %cst_106 = arith.constant dense<0.000000e+00> : vector<32x16xf32>
    %235 = tpu.matmul %234, %217, %cst_106 {dimension_numbers = #tpu.dot_dimension_numbers<[1], [0], [0], [1], [0, 0, 1, 1], [], []>} : vector<32x32xbf16>, vector<32x16xbf16>, vector<32x16xf32> -> vector<32x16xf32>
    %236 = arith.truncf %235 : vector<32x16xf32> to vector<32x16xbf16>
    %237 = vector.extract_strided_slice %180 {offsets = [1, 0, 0], sizes = [1, 16, 32], strides = [1, 1, 1]} : vector<2x16x32xbf16> to vector<1x16x32xbf16>
    %238 = vector.shape_cast %237 : vector<1x16x32xbf16> to vector<16x32xbf16>
    %cst_107 = arith.constant dense<0.000000e+00> : vector<32x32xf32>
    %239 = tpu.matmul %236, %238, %cst_107 {dimension_numbers = #tpu.dot_dimension_numbers<[1], [0], [0], [1], [0, 0, 1, 1], [], []>} : vector<32x16xbf16>, vector<16x32xbf16>, vector<32x32xf32> -> vector<32x32xf32>
    %240 = arith.addf %214, %239 : vector<32x32xf32>
    %241 = arith.addf %174, %240 : vector<32x32xf32>
    %242 = vector.broadcast %182 : vector<1x32xf32> to vector<32x32xf32>
    %243 = arith.addf %241, %242 : vector<32x32xf32>
    %c1_108 = arith.constant 1 : index
    %c0_109 = arith.constant 0 : index
    %c0_110 = arith.constant 0 : index
    %244 = vector.load %arg16[%c1_108, %c0_109, %c0_110] : memref<2x1x32xf32, #tpu.memory_space<vmem>>, vector<1x1x32xf32>
    %245 = vector.shape_cast %244 : vector<1x1x32xf32> to vector<1x32xf32>
    %c1_111 = arith.constant 1 : index
    %c0_112 = arith.constant 0 : index
    %c0_113 = arith.constant 0 : index
    %246 = vector.load %arg17[%c1_111, %c0_112, %c0_113] : memref<2x1x32xf32, #tpu.memory_space<vmem>>, vector<1x1x32xf32>
    %247 = vector.shape_cast %246 : vector<1x1x32xf32> to vector<1x32xf32>
    %cst_114 = arith.constant dense<0.000000e+00> : vector<32xf32>
    %248 = vector.multi_reduction <add>, %243, %cst_114 [1] : vector<32x32xf32> to vector<32xf32>
    %249 = vector.shape_cast %248 : vector<32xf32> to vector<32x1xf32>
    %cst_115 = arith.constant 3.200000e+01 : f32
    %250 = vector.broadcast %cst_115 : f32 to vector<32x1xf32>
    %251 = arith.divf %249, %250 : vector<32x1xf32>
    %252 = vector.broadcast %251 : vector<32x1xf32> to vector<32x32xf32>
    %253 = arith.subf %243, %252 : vector<32x32xf32>
    %254 = arith.mulf %253, %253 : vector<32x32xf32>
    %cst_116 = arith.constant dense<0.000000e+00> : vector<32xf32>
    %255 = vector.multi_reduction <add>, %254, %cst_116 [1] : vector<32x32xf32> to vector<32xf32>
    %256 = vector.shape_cast %255 : vector<32xf32> to vector<32x1xf32>
    %cst_117 = arith.constant 3.200000e+01 : f32
    %257 = vector.broadcast %cst_117 : f32 to vector<32x1xf32>
    %258 = arith.divf %256, %257 : vector<32x1xf32>
    %259 = vector.broadcast %251 : vector<32x1xf32> to vector<32x32xf32>
    %260 = arith.subf %243, %259 : vector<32x32xf32>
    %cst_118 = arith.constant 9.99999974E-6 : f32
    %261 = vector.broadcast %cst_118 : f32 to vector<32x1xf32>
    %262 = arith.addf %258, %261 : vector<32x1xf32>
    %263 = math.rsqrt %262 : vector<32x1xf32>
    %264 = vector.broadcast %263 : vector<32x1xf32> to vector<32x32xf32>
    %265 = arith.mulf %260, %264 : vector<32x32xf32>
    %266 = vector.broadcast %245 : vector<1x32xf32> to vector<32x32xf32>
    %267 = arith.mulf %265, %266 : vector<32x32xf32>
    %268 = vector.broadcast %247 : vector<1x32xf32> to vector<32x32xf32>
    %269 = arith.addf %267, %268 : vector<32x32xf32>
    %270 = arith.truncf %269 : vector<32x32xf32> to vector<32x32xbf16>
    %c1_119 = arith.constant 1 : index
    %c0_120 = arith.constant 0 : index
    %c0_121 = arith.constant 0 : index
    %271 = vector.load %arg12[%c1_119, %c0_120, %c0_121] : memref<2x32x64xbf16, #tpu.memory_space<vmem>>, vector<1x32x64xbf16>
    %272 = vector.shape_cast %271 : vector<1x32x64xbf16> to vector<32x64xbf16>
    %cst_122 = arith.constant dense<0.000000e+00> : vector<32x64xf32>
    %273 = tpu.matmul %270, %272, %cst_122 {dimension_numbers = #tpu.dot_dimension_numbers<[1], [0], [0], [1], [0, 0, 1, 1], [], []>} : vector<32x32xbf16>, vector<32x64xbf16>, vector<32x64xf32> -> vector<32x64xf32>
    %c1_123 = arith.constant 1 : index
    %c0_124 = arith.constant 0 : index
    %c0_125 = arith.constant 0 : index
    %274 = vector.load %arg13[%c1_123, %c0_124, %c0_125] : memref<2x1x64xf32, #tpu.memory_space<vmem>>, vector<1x1x64xf32>
    %275 = vector.shape_cast %274 : vector<1x1x64xf32> to vector<1x64xf32>
    %276 = vector.broadcast %275 : vector<1x64xf32> to vector<32x64xf32>
    %277 = arith.addf %273, %276 : vector<32x64xf32>
    %cst_126 = arith.constant 0.000000e+00 : f32
    %278 = vector.broadcast %cst_126 : f32 to vector<32x64xf32>
    %279 = arith.maximumf %277, %278 : vector<32x64xf32>
    %280 = arith.truncf %279 : vector<32x64xf32> to vector<32x64xbf16>
    %c1_127 = arith.constant 1 : index
    %c0_128 = arith.constant 0 : index
    %c0_129 = arith.constant 0 : index
    %281 = vector.load %arg14[%c1_127, %c0_128, %c0_129] : memref<2x64x32xbf16, #tpu.memory_space<vmem>>, vector<1x64x32xbf16>
    %282 = vector.shape_cast %281 : vector<1x64x32xbf16> to vector<64x32xbf16>
    %cst_130 = arith.constant dense<0.000000e+00> : vector<32x32xf32>
    %283 = tpu.matmul %280, %282, %cst_130 {dimension_numbers = #tpu.dot_dimension_numbers<[1], [0], [0], [1], [0, 0, 1, 1], [], []>} : vector<32x64xbf16>, vector<64x32xbf16>, vector<32x32xf32> -> vector<32x32xf32>
    %c1_131 = arith.constant 1 : index
    %c0_132 = arith.constant 0 : index
    %c0_133 = arith.constant 0 : index
    %284 = vector.load %arg15[%c1_131, %c0_132, %c0_133] : memref<2x1x32xf32, #tpu.memory_space<vmem>>, vector<1x1x32xf32>
    %285 = vector.shape_cast %284 : vector<1x1x32xf32> to vector<1x32xf32>
    %286 = vector.broadcast %285 : vector<1x32xf32> to vector<32x32xf32>
    %287 = arith.addf %283, %286 : vector<32x32xf32>
    %288 = arith.addf %269, %287 : vector<32x32xf32>
    %c1_134 = arith.constant 1 : index
    %c0_135 = arith.constant 0 : index
    %c0_136 = arith.constant 0 : index
    %289 = vector.load %arg18[%c1_134, %c0_135, %c0_136] : memref<2x1x32xf32, #tpu.memory_space<vmem>>, vector<1x1x32xf32>
    %290 = vector.shape_cast %289 : vector<1x1x32xf32> to vector<1x32xf32>
    %c1_137 = arith.constant 1 : index
    %c0_138 = arith.constant 0 : index
    %c0_139 = arith.constant 0 : index
    %291 = vector.load %arg19[%c1_137, %c0_138, %c0_139] : memref<2x1x32xf32, #tpu.memory_space<vmem>>, vector<1x1x32xf32>
    %292 = vector.shape_cast %291 : vector<1x1x32xf32> to vector<1x32xf32>
    %cst_140 = arith.constant dense<0.000000e+00> : vector<32xf32>
    %293 = vector.multi_reduction <add>, %288, %cst_140 [1] : vector<32x32xf32> to vector<32xf32>
    %294 = vector.shape_cast %293 : vector<32xf32> to vector<32x1xf32>
    %cst_141 = arith.constant 3.200000e+01 : f32
    %295 = vector.broadcast %cst_141 : f32 to vector<32x1xf32>
    %296 = arith.divf %294, %295 : vector<32x1xf32>
    %297 = vector.broadcast %296 : vector<32x1xf32> to vector<32x32xf32>
    %298 = arith.subf %288, %297 : vector<32x32xf32>
    %299 = arith.mulf %298, %298 : vector<32x32xf32>
    %cst_142 = arith.constant dense<0.000000e+00> : vector<32xf32>
    %300 = vector.multi_reduction <add>, %299, %cst_142 [1] : vector<32x32xf32> to vector<32xf32>
    %301 = vector.shape_cast %300 : vector<32xf32> to vector<32x1xf32>
    %cst_143 = arith.constant 3.200000e+01 : f32
    %302 = vector.broadcast %cst_143 : f32 to vector<32x1xf32>
    %303 = arith.divf %301, %302 : vector<32x1xf32>
    %304 = vector.broadcast %296 : vector<32x1xf32> to vector<32x32xf32>
    %305 = arith.subf %288, %304 : vector<32x32xf32>
    %cst_144 = arith.constant 9.99999974E-6 : f32
    %306 = vector.broadcast %cst_144 : f32 to vector<32x1xf32>
    %307 = arith.addf %303, %306 : vector<32x1xf32>
    %308 = math.rsqrt %307 : vector<32x1xf32>
    %309 = vector.broadcast %308 : vector<32x1xf32> to vector<32x32xf32>
    %310 = arith.mulf %305, %309 : vector<32x32xf32>
    %311 = vector.broadcast %290 : vector<1x32xf32> to vector<32x32xf32>
    %312 = arith.mulf %310, %311 : vector<32x32xf32>
    %313 = vector.broadcast %292 : vector<1x32xf32> to vector<32x32xf32>
    %314 = arith.addf %312, %313 : vector<32x32xf32>
    %c0_145 = arith.constant 0 : index
    %c0_146 = arith.constant 0 : index
    %c0_147 = arith.constant 0 : index
    %315 = vector.load %arg20[%c0_145, %c0_146, %c0_147] : memref<1x32x32xf32, #tpu.memory_space<vmem>>, vector<1x32x32xf32>
    %316 = vector.shape_cast %315 : vector<1x32x32xf32> to vector<32x32xf32>
    %317 = vector.shape_cast %314 : vector<32x32xf32> to vector<1x32x32xf32>
    tpu.vector_store %arg20[%c0_145, %c0_146, %c0_147], %317 {strides = array<i32>} : memref<1x32x32xf32, #tpu.memory_space<vmem>>, vector<1x32x32xf32>,
    %318 = vector.extract_strided_slice %314 {offsets = [0, 0], sizes = [4, 32], strides = [1, 1]} : vector<32x32xf32> to vector<4x32xf32>
    %319 = vector.extract_strided_slice %314 {offsets = [4, 0], sizes = [4, 32], strides = [1, 1]} : vector<32x32xf32> to vector<4x32xf32>
    %320 = arith.addf %318, %319 : vector<4x32xf32>
    %321 = vector.extract_strided_slice %314 {offsets = [8, 0], sizes = [4, 32], strides = [1, 1]} : vector<32x32xf32> to vector<4x32xf32>
    %322 = arith.addf %320, %321 : vector<4x32xf32>
    %323 = vector.extract_strided_slice %314 {offsets = [12, 0], sizes = [4, 32], strides = [1, 1]} : vector<32x32xf32> to vector<4x32xf32>
    %324 = arith.addf %322, %323 : vector<4x32xf32>
    %325 = vector.extract_strided_slice %314 {offsets = [16, 0], sizes = [4, 32], strides = [1, 1]} : vector<32x32xf32> to vector<4x32xf32>
    %326 = arith.addf %324, %325 : vector<4x32xf32>
    %327 = vector.extract_strided_slice %314 {offsets = [20, 0], sizes = [4, 32], strides = [1, 1]} : vector<32x32xf32> to vector<4x32xf32>
    %328 = arith.addf %326, %327 : vector<4x32xf32>
    %329 = vector.extract_strided_slice %314 {offsets = [24, 0], sizes = [4, 32], strides = [1, 1]} : vector<32x32xf32> to vector<4x32xf32>
    %330 = arith.addf %328, %329 : vector<4x32xf32>
    %331 = vector.extract_strided_slice %314 {offsets = [28, 0], sizes = [4, 32], strides = [1, 1]} : vector<32x32xf32> to vector<4x32xf32>
    %332 = arith.addf %330, %331 : vector<4x32xf32>
    %cst_148 = arith.constant 1.250000e-01 : f32
    %333 = vector.broadcast %cst_148 : f32 to vector<4x32xf32>
    %334 = arith.mulf %332, %333 : vector<4x32xf32>
    %c0_149 = arith.constant 0 : index
    %c0_150 = arith.constant 0 : index
    %c0_151 = arith.constant 0 : index
    %335 = vector.load %arg21[%c0_149, %c0_150, %c0_151] : memref<1x4x32xf32, #tpu.memory_space<vmem>>, vector<1x4x32xf32>
    %336 = vector.shape_cast %335 : vector<1x4x32xf32> to vector<4x32xf32>
    %337 = vector.shape_cast %334 : vector<4x32xf32> to vector<1x4x32xf32>
    tpu.vector_store %arg21[%c0_149, %c0_150, %c0_151], %337 {strides = array<i32>} : memref<1x4x32xf32, #tpu.memory_space<vmem>>, vector<1x4x32xf32>,
    return
  }
  func.func @transform_0(%arg0: i32) -> (i32, i32, i32) {
    %c0_i32 = arith.constant 0 : i32
    %c0_i32_0 = arith.constant 0 : i32
    %c0_i32_1 = arith.constant 0 : i32
    return %arg0, %c0_i32, %c0_i32_0 : i32, i32, i32
  }
  func.func @transform_1(%arg0: i32) -> (i32, i32) {
    %c0_i32 = arith.constant 0 : i32
    %c0_i32_0 = arith.constant 0 : i32
    %c0_i32_1 = arith.constant 0 : i32
    return %c0_i32, %c0_i32_0 : i32, i32
  }
  func.func @transform_2(%arg0: i32) -> (i32, i32) {
    %c0_i32 = arith.constant 0 : i32
    %c0_i32_0 = arith.constant 0 : i32
    %c0_i32_1 = arith.constant 0 : i32
    return %c0_i32, %c0_i32_0 : i32, i32
  }
  func.func @transform_3(%arg0: i32) -> (i32, i32) {
    %c0_i32 = arith.constant 0 : i32
    %c0_i32_0 = arith.constant 0 : i32
    %c0_i32_1 = arith.constant 0 : i32
    return %c0_i32, %c0_i32_0 : i32, i32
  }
  func.func @transform_4(%arg0: i32) -> (i32, i32, i32) {
    %c0_i32 = arith.constant 0 : i32
    %c0_i32_0 = arith.constant 0 : i32
    %c0_i32_1 = arith.constant 0 : i32
    return %arg0, %c0_i32, %c0_i32_0 : i32, i32, i32
  }
  func.func @transform_5(%arg0: i32) -> (i32, i32) {
    %c0_i32 = arith.constant 0 : i32
    %c0_i32_0 = arith.constant 0 : i32
    %c0_i32_1 = arith.constant 0 : i32
    return %c0_i32, %c0_i32_0 : i32, i32
  }
  func.func @transform_6(%arg0: i32) -> (i32, i32) {
    %c0_i32 = arith.constant 0 : i32
    %c0_i32_0 = arith.constant 0 : i32
    %c0_i32_1 = arith.constant 0 : i32
    return %c0_i32, %c0_i32_0 : i32, i32
  }
  func.func @transform_7(%arg0: i32) -> (i32, i32, i32) {
    %c0_i32 = arith.constant 0 : i32
    %c0_i32_0 = arith.constant 0 : i32
    %c0_i32_1 = arith.constant 0 : i32
    %c0_i32_2 = arith.constant 0 : i32
    return %c0_i32, %c0_i32_0, %c0_i32_1 : i32, i32, i32
  }
  func.func @transform_8(%arg0: i32) -> (i32, i32, i32) {
    %c0_i32 = arith.constant 0 : i32
    %c0_i32_0 = arith.constant 0 : i32
    %c0_i32_1 = arith.constant 0 : i32
    %c0_i32_2 = arith.constant 0 : i32
    return %c0_i32, %c0_i32_0, %c0_i32_1 : i32, i32, i32
  }
  func.func @transform_9(%arg0: i32) -> (i32, i32, i32, i32) {
    %c0_i32 = arith.constant 0 : i32
    %c0_i32_0 = arith.constant 0 : i32
    %c0_i32_1 = arith.constant 0 : i32
    %c0_i32_2 = arith.constant 0 : i32
    %c0_i32_3 = arith.constant 0 : i32
    return %c0_i32, %c0_i32_0, %c0_i32_1, %c0_i32_2 : i32, i32, i32, i32
  }
  func.func @transform_10(%arg0: i32) -> (i32, i32, i32) {
    %c0_i32 = arith.constant 0 : i32
    %c0_i32_0 = arith.constant 0 : i32
    %c0_i32_1 = arith.constant 0 : i32
    %c0_i32_2 = arith.constant 0 : i32
    return %c0_i32, %c0_i32_0, %c0_i32_1 : i32, i32, i32
  }
  func.func @transform_11(%arg0: i32) -> (i32, i32, i32) {
    %c0_i32 = arith.constant 0 : i32
    %c0_i32_0 = arith.constant 0 : i32
    %c0_i32_1 = arith.constant 0 : i32
    %c0_i32_2 = arith.constant 0 : i32
    return %c0_i32, %c0_i32_0, %c0_i32_1 : i32, i32, i32
  }
  func.func @transform_12(%arg0: i32) -> (i32, i32, i32) {
    %c0_i32 = arith.constant 0 : i32
    %c0_i32_0 = arith.constant 0 : i32
    %c0_i32_1 = arith.constant 0 : i32
    %c0_i32_2 = arith.constant 0 : i32
    return %c0_i32, %c0_i32_0, %c0_i32_1 : i32, i32, i32
  }
  func.func @transform_13(%arg0: i32) -> (i32, i32, i32) {
    %c0_i32 = arith.constant 0 : i32
    %c0_i32_0 = arith.constant 0 : i32
    %c0_i32_1 = arith.constant 0 : i32
    %c0_i32_2 = arith.constant 0 : i32
    return %c0_i32, %c0_i32_0, %c0_i32_1 : i32, i32, i32
  }
  func.func @transform_14(%arg0: i32) -> (i32, i32, i32) {
    %c0_i32 = arith.constant 0 : i32
    %c0_i32_0 = arith.constant 0 : i32
    %c0_i32_1 = arith.constant 0 : i32
    %c0_i32_2 = arith.constant 0 : i32
    return %c0_i32, %c0_i32_0, %c0_i32_1 : i32, i32, i32
  }
  func.func @transform_15(%arg0: i32) -> (i32, i32, i32) {
    %c0_i32 = arith.constant 0 : i32
    %c0_i32_0 = arith.constant 0 : i32
    %c0_i32_1 = arith.constant 0 : i32
    %c0_i32_2 = arith.constant 0 : i32
    return %c0_i32, %c0_i32_0, %c0_i32_1 : i32, i32, i32
  }
  func.func @transform_16(%arg0: i32) -> (i32, i32, i32) {
    %c0_i32 = arith.constant 0 : i32
    %c0_i32_0 = arith.constant 0 : i32
    %c0_i32_1 = arith.constant 0 : i32
    %c0_i32_2 = arith.constant 0 : i32
    return %c0_i32, %c0_i32_0, %c0_i32_1 : i32, i32, i32
  }
  func.func @transform_17(%arg0: i32) -> (i32, i32, i32) {
    %c0_i32 = arith.constant 0 : i32
    %c0_i32_0 = arith.constant 0 : i32
    %c0_i32_1 = arith.constant 0 : i32
    %c0_i32_2 = arith.constant 0 : i32
    return %c0_i32, %c0_i32_0, %c0_i32_1 : i32, i32, i32
  }
  func.func @transform_18(%arg0: i32) -> (i32, i32, i32) {
    %c0_i32 = arith.constant 0 : i32
    %c0_i32_0 = arith.constant 0 : i32
    %c0_i32_1 = arith.constant 0 : i32
    %c0_i32_2 = arith.constant 0 : i32
    return %c0_i32, %c0_i32_0, %c0_i32_1 : i32, i32, i32
  }
  func.func @transform_19(%arg0: i32) -> (i32, i32, i32) {
    %c0_i32 = arith.constant 0 : i32
    %c0_i32_0 = arith.constant 0 : i32
    %c0_i32_1 = arith.constant 0 : i32
    return %arg0, %c0_i32, %c0_i32_0 : i32, i32, i32
  }
  func.func @transform_20(%arg0: i32) -> (i32, i32, i32) {
    %c0_i32 = arith.constant 0 : i32
    %c0_i32_0 = arith.constant 0 : i32
    %c0_i32_1 = arith.constant 0 : i32
    return %arg0, %c0_i32, %c0_i32_0 : i32, i32, i32
  }
}

</mosaic_0001>

<bundles_post_ra>
// kernel: tpu_custom_call.1
= control target key start
LH: loop header
LB: loop body
LE: loop exit
PB: predicated region body
PF: predicated region fallthrough
CT: control target
= control target key end

     0   :  { %s4901_s0 = inlined_call_operand.vmem [shape: f32[2,32,4], index: 0, kind: input, shape index: {}]   ;;  %s4902_s1 = inlined_call_operand.vmem [shape: f32[32,32], index: 1, kind: input, shape index: {}]   ;;  %s4903_s2 = inlined_call_operand.vmem [shape: s32[32,1], index: 2, kind: input, shape index: {}]   ;;  %s4904_s3 = inlined_call_operand.hbm [shape: s32[1,32], index: 3, kind: input, shape index: {}]   ;;  %s4905_s4 = inlined_call_operand.vmem [shape: f32[2,4,4], index: 4, kind: input, shape index: {}]   ;;  %s4906_s5 = inlined_call_operand.vmem [shape: bf16[4,32], index: 5, kind: input, shape index: {}]   ;;  %s4907_s6 = inlined_call_operand.vmem [shape: f32[1,32], index: 6, kind: input, shape index: {}]   ;;  %s4908_s7 = inlined_call_operand.vmem [shape: bf16[2,32,160], index: 7, kind: input, shape index: {}]   ;;  %s4909_s8 = inlined_call_operand.vmem [shape: f32[2,1,160], index: 8, kind: input, shape index: {}]   ;;  %s4910_s9 = inlined_call_operand.vmem [shape: bf16[2,2,16,32], index: 9, kind: input, shape index: {}]   ;;  %s4911_s10 = inlined_call_operand.vmem [shape: f32[2,1,32], index: 10, kind: input, shape index: {}]   ;;  %s4912_s11 = inlined_call_operand.vmem [shape: bf16[2,32,64], index: 11, kind: input, shape index: {}]   ;;  %s4913_s12 = inlined_call_operand.vmem [shape: f32[2,1,64], index: 12, kind: input, shape index: {}]   ;;  %s4914_s13 = inlined_call_operand.vmem [shape: bf16[2,64,32], index: 13, kind: input, shape index: {}]   ;;  %s4915_s14 = inlined_call_operand.vmem [shape: f32[2,1,32], index: 14, kind: input, shape index: {}]   ;;  %s4916_s15 = inlined_call_operand.vmem [shape: f32[2,1,32], index: 15, kind: input, shape index: {}]   ;;  %s4917_s16 = inlined_call_operand.vmem [shape: f32[2,1,32], index: 16, kind: input, shape index: {}]   ;;  %s4918_s17 = inlined_call_operand.vmem [shape: f32[2,1,32], index: 17, kind: input, shape index: {}]   ;;  %s4919_s18 = inlined_call_operand.vmem [shape: f32[2,1,32], index: 18, kind: input, shape index: {}]   ;;  %s4920_s19 = inlined_call_operand.hbm [shape: f32[2,32,32], index: 19, kind: output, shape index: {0}]   ;;  %s4921_s20 = inlined_call_operand.hbm [shape: f32[2,4,32], index: 20, kind: output, shape index: {1}]  }
   0x1   :  { %4946 = sst [smem:[#allocation17_spill]] %s4901_s0 }
   0x2   :  { %4947 = sst [smem:[#allocation18_spill]] %s4902_s1 }
   0x3   :  { %4948 = sst [smem:[#allocation19_spill]] %s4903_s2 }
   0x4   :  { %4949 = sst [smem:[#allocation20_spill]] %s4904_s3 }
   0x5   :  { %4950 = sst [smem:[#allocation21_spill]] %s4905_s4 }
   0x6   :  { %4951 = sst [smem:[#allocation22_spill]] %s4906_s5 }
   0x7   :  { %4952 = sst [smem:[#allocation23_spill]] %s4907_s6 }
   0x8   :  { %4953 = sst [smem:[#allocation24_spill]] %s4908_s7 }
   0x9   :  { %4954 = sst [smem:[#allocation25_spill]] %s4909_s8 }
   0xa   :  { %26 = vsyncpa [#allocation3], 0 }
   0xb   :  { %27 = vsyncpa [#allocation4], 0 }
   0xc   :  { %29 = vsyncpa [#allocation4 + $0x1], 0 }
   0xd   :  { %30 = vsyncpa [#allocation7], 0 }
   0xe   :  { %32 = vsyncpa [#allocation7 + $0x1], 0  ;;  %s4148_s1 = smov 0   ;;  %s4150_s22 = smov 0  }
   0xf   :  { %s4152_s23 = smov 0   ;;  %s4154_s24 = smov 0  }
  0x10 LB: > { %4955 = sst [smem:[#allocation11_spill]] %s4015_s1  ;;  %s4169_s2 = sadd.s32 4294967295, %s4027_s24   ;;  %s4027_s24 = sphi %s4154_s24, %s4991_s24   ;;  %s4023_s23 = sphi %s4152_s23, %s4993_s23   ;;  %s4019_s22 = sphi %s4150_s22, %s4995_s22   ;;  %s4015_s1 = sphi %s4148_s1, %s4994_s1  }
  0x11   : > { %4956 = sst [smem:[#allocation12_spill]] %s4023_s23  ;;  %s3272_s25 = sadd.s32 4294967294, %s4027_s24  }
  0x12   : > { %4957 = sst [smem:[#allocation13_spill]] %s4027_s24  ;;  %s4173_s3 = sadd.s32 1, %s4027_s24  }
  0x13   : > { %4958 = sst [smem:[#allocation14_spill]] %s4173_s3  ;;  %s454_s26 = sadd.s32 1, %s4023_s23 }
  0x14   : > { %s451_s27 = ssub.s32 %s4027_s24, %s4173_s3  ;;  %p464_p0 = scmp.ne.s32.totalorder %s4023_s23, %s4019_s22 }
  0x15   : > { %p452_p1 = scmp.eq.s32.totalorder %s451_s27, 0  ;;  %p465_p2 = scmp.eq.s32.totalorder %s4169_s2, 1 }
  0x16   : > { %p470_p3 = scmp.ne.s32.totalorder %s4019_s22, %s4015_s1  ;;  %p471_p4 = scmp.eq.s32.totalorder %s3272_s25, 1 }
  0x17   : > { %s4184_s28 = scalar_select %p452_p1, %s4023_s23, %s454_s26  }
  0x18   : > { %p4186_p5 = por %p465_p2, %p464_p0  ;;  %p4190_p6 = por %p471_p4, %p470_p3 }
  0x19   : > { %4959 = sst [smem:[#allocation15_spill]] %s4184_s28  ;;  %p3273_p7 = scmp.ge.s32.totalorder %s4027_s24, 1 }
  0x1a   : > { %s4960_s4 = scalar_select %p4186_p5, 1, 0 }
  0x1b   : > { %s4961_s29 = scalar_select %p4190_p6, 1, 0 }
  0x1c   : > { %p504_p8 = scmp.lt.s32.totalorder %s4027_s24, 3  ;;  %p4931_p9 = scmp.eq.s32.totalorder %s4169_s2, 0 }
  0x1d   : > { %4962 = sst [smem:[#allocation16_spill]] %s4961_s29  ;;  %s4029_s0 = smov [#allocation2]  }
  0x1e   : > { %p4197_p10 = pnand %p3273_p7, %p504_p8  ;;  %s523_s21 = sshll.u32 %s4029_s0, 4  ;;  %s524_s21 = int_to_ptr.vmem [resolvable:$true] %s523_s21 }
  0x1f   : > { %s4965_s28 = sld [smem:[#allocation20_spill]] }
  0x20   : > { %s4963_s30 = scalar_select %p4197_p10, 1, 0 }
  0x21   : > { %p3717_p11 = pneg %p4197_p10 }
  0x23   : > { %p4205_p12 = pnand %p4931_p9, %p3717_p11 }
  0x25   : > { %s3901_s23 = scalar_lea.hbm %s4965_s28, 16  ;;  %p3903_p0 = pneg %p4205_p12 }
  0x26   : > { %p3902_p13 = scmp.ne.s32.totalorder %s4965_s28, %s3901_s23  ;;  %p3908_p3 = scmp.lt.u32.totalorder %s3901_s23, %s4965_s28 }
  0x28   : > { %p3904_p1 = pnand %p3903_p0, %p3902_p13 }
  0x2a   : > { %p3905_p2 = pneg %p3904_p1 }
  0x2c   : > { %p3910_p4 = pnand %p3908_p3, %p3905_p2 }
  0x2e   : > { %3913 = shalt.err (!%p3910_p4)
}
  0x2f   : > { %s3914_s24 = scalar_lea.vmem %s524_s21, 16  ;;  %s3921_s26 = scalar_lea.vmem %s524_s21, 32 }
  0x30   : > { %p3915_p7 = scmp.ne.s32.totalorder %s524_s21, %s3914_s24  ;;  %p3922_p9 = scmp.lt.s32.totalorder %s524_s21, %s524_s21 }
  0x31   : > { %p3923_p6 = scmp.lt.s32.totalorder %s3921_s26, %s3914_s24 }
  0x32   : > { %p3917_p8 = pnand %p3915_p7, %p3903_p0 }
  0x33   : > { %p3924_p5 = por %p3923_p6, %p3922_p9 }
  0x34   : > { %p3918_p11 = pneg %p3917_p8 }
  0x36   : > { %p3925_p10 = pnand %p3924_p5, %p3918_p11 }
  0x38   : > { %3928 = shalt.err (!%p3925_p10)
}
  0x39   : > { %3720 = dma.hbm_to_vmem [thread:$0]  (!%p4205_p12), %s4965_s28, 16, %s524_s21, [#allocation3]  }
  0x3a   : > { %p4966_p13 = scmp.ne.s32.totalorder %s4963_s30, 0 }
  0x3b   : > { %p4967_p1 = scmp.eq.s32.totalorder (!%p4966_p13), %s4169_s2, 0 }
  0x3c   : > { %593 = sbr.rel (%p4966_p13) target bundleno = 6306 (0x18a2), region = 96 }
  0x43   : > { %4002 = dma.done.wait (%p4967_p1), [#allocation3], 16   ;;  %p4968_p0 = pmov %p4967_p1 }
  0x44   : > { %p660_p6 = scmp.lt.s32.totalorder %s4169_s2, 1  ;;  %v4030_v0 = vmov 0   ;;  %vm691_vm0 = vcmask 1041408   ;;  %s4969_s21 = sld [smem:[#allocation17_spill]]  ;;  %vm684_vm1 = vcmask 31744   ;;  %v777_v18 = vlaneseq }
  0x45   : > { %4004 = vsyncadd (%p4968_p0), [#allocation3], 4294967280  ;;  %3775 = vset.pattern.permute.xlu0 %v4030_v0  ;;  %3776 = vset.pattern.permute.xlu1 %v4030_v0  ;;  %s4970_s5 = sld [smem:[#allocation22_spill]]  ;;  %s4971_s29 = sld [smem:[#allocation19_spill]]  ;;  %v4031_v23 = vmov 0.0   ;;  %vm963_vm6 = vcmask 261120  }
  0x46   : > { %s661_s1 = scalar_select %p660_p6, %s4169_s2, 1  ;;  %v778_v19 = vand.u32 127, %v777_v18  ;;  %v4308_v49 = vshrl.u32 %v777_v18, 7  ;;  %v4310_v50 = vld [vmem:[#allocation2] ss:$0 sm:$0xff]  ;;  %vm1033_vm8 = vcmask 130048  }
  0x47   : > { %s4973_s7 = sld [smem:[#allocation24_spill]]  ;;  %s4974_s6 = sld [smem:[#allocation23_spill]]  ;;  %vm1870_vm13 = vcmask 523264  }
  0x48   : > { %s3413_s23 = sshll.u32 %s661_s1, 5  ;;  %s3282_s0 = sshll.u32 %s661_s1, 2  ;;  %vm795_vm7 = vcmp.eq.s32.totalorder %v4308_v49, %v4310_v50 }
  0x49   : > { %s4975_s1 = sld [smem:[#allocation18_spill]]  ;;  %v3291_v53 = vsel %vm795_vm7, 1.0, %v4031_v23  ;;  %s4977_s8 = sld [smem:[#allocation25_spill]] }
  0x4a   : > { %s664_s25 = scalar_lea.vmem %s4969_s21, %s3413_s23  ;;  %s4972_s23 = sld [smem:[#allocation21_spill]]  ;;  %v798_v55 = vpack.c.bf16 %v3291_v53, %v3291_v53 }
  0x4b   : > { %v676_v1 = vld [vmem:[%s4970_s5] sm:$0x3]  ;;  %v671_v3 = vld [vmem:[%s664_s25 + $0x8] sm:$0xff]  ;;  %v672_v6 = vld [vmem:[%s664_s25 + $0x10] sm:$0xff]  ;;  %s4940_s26 = smov 96   ;;  %s4938_s3 = smov 32  }
  0x4c   : > { %v670_v2 = vld [vmem:[%s664_s25] sm:$0xff]  ;;  %3690 = vmatprep.subr.msk.bf16.mxu0 %vm691_vm0, %v676_v1  ;;  %v693_v4 = vsel %vm691_vm0, %v676_v1, 0  ;;  %v673_v7 = vld [vmem:[%s664_s25 + $0x18] sm:$0xff]  ;;  %v754_v10 = vld [vmem:[%s4971_s29 + $0x10] sm:$0xff]  ;;  %v869_v57 = vsel %vm691_vm0, %v798_v55, 0  ;;  %v935_v1 = vsub.s32 0, %v4308_v49 }
  0x4d   : > { %v674_v5 = vpack.c.bf16 %v671_v3, %v670_v2  ;;  %v752_v8 = vld [vmem:[%s4971_s29] sm:$0xff]  ;;  %3505 = vmatpush3.bf16.msra.mxu0 %v693_v4  ;;  %v675_v9 = vpack.c.bf16 %v673_v7, %v672_v6  ;;  %v753_v11 = vld [vmem:[%s4971_s29 + $0x8] sm:$0xff]  ;;  %764 = vperm.xlu1 %3776, %v754_v10   ;;  %v755_v12 = vld [vmem:[%s4971_s29 + $0x18] sm:$0xff]  ;;  %v939_v3 = vsub.s32 1, %v4308_v49  ;;  %s4944_s25 = smov 112   ;;  %s4979_s21 = smov 80  }
  0x4e   : > { %758 = vperm.xlu0 %3775, %v752_v8   ;;  %v3779_v17 = vld [vmem:[%s4973_s7 + $0x4] ss:$8 sps:$4 sm:$0xff]   ;;  %v3777_v30 = vld [vmem:[%s4973_s7] ss:$8 sps:$4 sm:$0xff]   ;;  %v3782_v32 = vld [vmem:[%s4973_s7 + $0x14] ss:$8 sps:$4 sm:$0xff]   ;;  %3692 = vmatprep.subr.msk.bf16.mxu0 %vm691_vm0, %v798_v55 }
  0x4f   : > { %3506 = vmatprep.mubr.msk.bf16.mxu0 %vm684_vm1, %v674_v5  ;;  %v3780_v33 = vld [vmem:[%s4973_s7 + $0x10] ss:$8 sps:$4 sm:$0xff]   ;;  %v3283_v34 = vld [vmem:[%s4974_s6] ss:$0 sm:$0xff]  ;;  %s4976_s27 = smov %s4975_s1  ;;  %p4984_p9 = scmp.ne.s32.totalorder %s4960_s4, 0 }
  0x50   : > { %3507 = vmatmul.mubr.msk.bf16.vlgmr.msra.gmra.mrb[0].mxu0 %vm684_vm1, %v675_v9  ;;  %s668_s24 = scalar_lea.vmem %s4972_s23, %s3282_s0  ;;  %v744_v39 = vld [vmem:[%s4975_s1] sm:$0xff]  ;;  %v745_v41 = vld [vmem:[%s4976_s27 + $0x8] sm:$0xff]  ;;  %v747_v47 = vld [vmem:[%s4976_s27 + $0x18] sm:$0xff]  ;;  %s4032_s1 = smov 64  }
  0x51   : > { %767 = vperm.xlu1 %3776, %v755_v12   ;;  %v799_v13 = vld [vmem:[%s668_s24] sm:$0xf]  ;;  %v746_v51 = vld [vmem:[%s4976_s27 + $0x10] sm:$0xff]  ;;  %3517 = vmatpush3.bf16.msra.mxu0 %v869_v57  ;;  %s4942_s0 = smov 80   ;;  %s4936_s23 = smov 48  }
  0x52   : > { %761 = vperm.xlu0 %3775, %v753_v11   ;;  %v800_v14 = vmax.f32 %v799_v13, -1e+09  ;;  %v924_v2 = vld [vmem:[%s4977_s8] sm:$0x3]  ;;  %s4934_s24 = smov 16  }
  0x53   : > { %v936_v4 = vrot.slane %v924_v2, %v935_v1  ;;  %v940_v6 = vrot.slane %v924_v2, %v939_v3 }
  0x54   : > { %v801_v15 = vpack.c.bf16 %v800_v14, %v800_v14 }
  0x56   : > { %3691 = vmatprep.subr.msk.bf16.mxu1 %vm691_vm0, %v801_v15  ;;  %v809_v16 = vsel %vm691_vm0, %v801_v15, 0 }
  0x57   : > { %3511 = vmatpush3.bf16.msra.mxu1 %v809_v16 }
  0x58   : > { %970 = vmatprep.subr.bf16.mxu1 %v3779_v17 }
  0xcc   : > { %v4267_v21 = vpop.permute.xlu1 %764 }
  0xcd   : > { %v4265_v20 = vpop.permute.xlu0 %758  ;;  %vm783_vm3 = vcmp.eq.s32.totalorder %v778_v19, %v4267_v21  ;;  %vm775_vm9 = vcmp.eq.s32.totalorder %v4267_v21, %v4310_v50 }
  0xce   : > { %vm781_vm2 = vcmp.eq.s32.totalorder %v778_v19, %v4265_v20  ;;  %v3289_v25 = vsel %vm783_vm3, 1.0, %v4031_v23  ;;  %vm773_vm10 = vcmp.eq.s32.totalorder %v4265_v20, %v4310_v50 }
  0xcf   : > { %v3287_v24 = vsel %vm781_vm2, 1.0, %v4031_v23 }
  0xd0   : > { %v4273_v26 = vpop.permute.xlu1 %767 }
  0xd1   : > { %v4271_v22 = vpop.permute.xlu0 %761  ;;  %vm784_vm5 = vcmp.eq.s32.totalorder %v778_v19, %v4273_v26  ;;  %vm776_vm11 = vcmp.eq.s32.totalorder %v4273_v26, %v4310_v50 }
  0xd2   : > { %vm782_vm4 = vcmp.eq.s32.totalorder %v778_v19, %v4271_v22  ;;  %v3290_v28 = vsel %vm784_vm5, 1.0, %v4031_v23  ;;  %vm774_vm12 = vcmp.eq.s32.totalorder %v4271_v22, %v4310_v50 }
  0xd3   : > { %v3288_v27 = vsel %vm782_vm4, 1.0, %v4031_v23  ;;  %v794_v31 = vpack.c.bf16 %v3290_v28, %v3289_v25 }
  0xd4   : > { %v793_v29 = vpack.c.bf16 %v3288_v27, %v3287_v24 }
  0xd6   : > { %3512 = vmatprep.mubr.msk.bf16.mxu1 %vm684_vm1, %v793_v29 }
  0xd7   : > { %3513 = vmatmul.mubr.msk.bf16.vlgmr.msra.gmra.mrb[0].mxu1 %vm684_vm1, %v794_v31 }
  0xd8   : > { %971 = vmatpush1.bf16.msra.mxu1 %v3777_v30  ;;  %1002 = vmatprep.mubr.bf16.mxu1 %v4030_v0 }
  0xd9   : > { %972 = vmatprep.subr.bf16.mxu1 %v3782_v32 }
  0xdc   : > { %973 = vmatpush1.bf16.msra.mxu1 %v3780_v33 }
 0x123   : > { %v3508_v35 = vpop.f32.mrb[0].mxu0 }
 0x124   : > { %v729_v36 = vpop.f32.mrb[1].mxu0  ;;  %v738_v48 = vadd.f32 %v3508_v35, %v3283_v34 }
 0x125   : > { %v730_v37 = vadd.f32 %v3283_v34, %v729_v36  ;;  %v3509_v38 = vpop.f32.mrb[2].mxu0 }
 0x126   : > { %v732_v40 = vpop.f32.mrb[3].mxu0  ;;  %v741_v45 = vadd.f32 %v3509_v38, %v3283_v34  ;;  %v4320_v54 = vadd.f32 %v746_v51, %v738_v48 }
 0x127   : > { %v733_v42 = vadd.f32 %v3283_v34, %v732_v40  ;;  %v4298_v43 = vadd.f32 %v744_v39, %v730_v37 }
 0x128   : > { %v4316_v52 = vadd.f32 %v747_v47, %v741_v45 }
 0x129   : > { %v4300_v44 = vadd.f32 %v745_v41, %v733_v42 }
 0x12a   : > { %v931_v56 = vpack.c.bf16 %v4316_v52, %v4320_v54 }
 0x12b   : > { %v930_v46 = vpack.c.bf16 %v4300_v44, %v4298_v43 }
 0x12d   : > { %3300 = vmatmul.mubr.msk.bf16.vlgmr.msra.gmra.mrb[4].mxu1 %vm963_vm6, %v930_v46 }
 0x12e   : > { %1012 = vmatprep.mubr.bf16.mxu1 %v4030_v0 }
 0x135   : > { %3301 = vmatmul.mubr.msk.bf16.gmra.mrb[8].mxu1 %vm963_vm6, %v931_v56 }
 0x1aa   : > { %v3514_v58 = vpop.f32.mrb[0].mxu1 }
 0x1ab   : > { %v845_v59 = vpop.f32.mrb[1].mxu1 }
 0x1ac   : > { %v3515_v60 = vpop.f32.mrb[2].mxu1 }
 0x1ad   : > { %v861_v61 = vpack.c.bf16 %v3515_v60, %v3514_v58  ;;  %v848_v62 = vpop.f32.mrb[3].mxu1 }
 0x1ae   : > { %v860_v63 = vpack.c.bf16 %v848_v62, %v845_v59 }
 0x1b0   : > { %3518 = vmatprep.mubr.msk.bf16.mxu0 %vm684_vm1, %v860_v63 }
 0x1b1   : > { %3519 = vmatmul.mubr.msk.bf16.vlgmr.msra.gmra.mrb[4].mxu0 %vm684_vm1, %v861_v61 }
 0x200   : > { %v1004_v5 = vpop.f32.mrb[4].mxu1 }
 0x201   : > { %v1006_v7 = vpop.f32.mrb[5].mxu1  ;;  %v1005_v9 = vadd.f32 %v1004_v5, %v936_v4 }
 0x202   : > { %v1008_v8 = vpop.f32.mrb[6].mxu1  ;;  %v1007_v12 = vadd.f32 %v1006_v7, %v940_v6 }
 0x203   : > { %v1009_v10 = vadd.f32 %v1008_v8, %v936_v4  ;;  %v1010_v11 = vpop.f32.mrb[7].mxu1 }
 0x204   : > { %v1011_v13 = vadd.f32 %v1010_v11, %v940_v6 }
 0x205   : > { %v4338_v14 = vpack.c.bf16 %v1009_v10, %v1005_v9 }
 0x206   : > { %v4340_v15 = vpack.c.bf16 %v1011_v13, %v1007_v12 }
 0x207   : > { %1099 = vrot.lane.b32.xlu1 %v4338_v14, %s4032_s1  ;;  %1029 = vrot.lane.b32.xlu0 %v4338_v14, %s4944_s25 }
 0x208   : > { %3526 = vmatprep.mubr.msk.bf16.mxu0 %vm1033_vm8, %v4338_v14  ;;  %v1014_v16 = vpop.f32.mrb[8].mxu1 }
 0x209   : > { %v1016_v17 = vpop.f32.mrb[9].mxu1  ;;  %v1015_v19 = vadd.f32 %v1014_v16, %v936_v4 }
 0x20a   : > { %v1018_v18 = vpop.f32.mrb[10].mxu1  ;;  %v1017_v25 = vadd.f32 %v1016_v17, %v940_v6 }
 0x20b   : > { %v1019_v23 = vadd.f32 %v1018_v18, %v936_v4  ;;  %v1020_v24 = vpop.f32.mrb[11].mxu1 }
 0x20c   : > { %v1021_v27 = vadd.f32 %v1020_v24, %v940_v6 }
 0x20d   : > { %v4348_v28 = vpack.c.bf16 %v1019_v23, %v1015_v19 }
 0x20e   : > { %v4350_v29 = vpack.c.bf16 %v1021_v27, %v1017_v25 }
 0x20f   : > { %1101 = vrot.lane.b32.xlu1 %v4348_v28, %s4032_s1  ;;  %1031 = vrot.lane.b32.xlu0 %v4348_v28, %s4944_s25 }
 0x213   : > { %1097 = vrot.lane.b32.xlu1 %v4348_v28, %s4942_s0  ;;  %1095 = vrot.lane.b32.xlu0 %v4338_v14, %s4942_s0  ;;  %s4978_s0 = smov 112  }
 0x279   : > { %v1100_v30 = vpop.permute.xlu1 %1099  ;;  %v1030_v31 = vpop.permute.xlu0 %1029 }
 0x27a   : > { %v1110_v32 = vsel %vm1033_vm8, %v1100_v30, 0  ;;  %v1041_v33 = vsel %vm1033_vm8, %v1030_v31, 0  ;;  %3693 = vmatprep.subr.msk.bf16.mxu0 %vm1033_vm8, %v1030_v31  ;;  %3695 = vmatprep.subr.msk.bf16.mxu1 %vm1033_vm8, %v1100_v30 }
 0x27b   : > { %3523 = vmatpush3.bf16.xpose.msra.mxu0 %v1041_v33  ;;  %3531 = vmatpush3.bf16.xpose.msra.mxu1 %v1110_v32 }
 0x281   : > { %v1102_v34 = vpop.permute.xlu1 %1101  ;;  %v1032_v35 = vpop.permute.xlu0 %1031 }
 0x282   : > { %v1113_v36 = vsel %vm1033_vm8, %v1102_v34, 0  ;;  %v1044_v37 = vsel %vm1033_vm8, %v1032_v35, 0  ;;  %3694 = vmatprep.subr.msk.bf16.mxu0 %vm1033_vm8, %v1032_v35  ;;  %3696 = vmatprep.subr.msk.bf16.mxu1 %vm1033_vm8, %v1102_v34 }
 0x283   : > { %3525 = vmatpush3.bf16.xpose.msra.mxu0 %v1044_v37  ;;  %3533 = vmatpush3.bf16.xpose.msra.mxu1 %v1113_v36 }
 0x284   : > { %v4368_v38 = vpop.f32.mrb[4].mxu0 }
 0x285   : > { %v4370_v39 = vpop.f32.mrb[5].mxu0  ;;  %v1096_v40 = vpop.permute.xlu0 %1095 }
 0x286   : > { %3534 = vmatprep.mubr.msk.bf16.mxu1 %vm1033_vm8, %v1096_v40  ;;  %v4373_v41 = vpop.f32.mrb[6].mxu0  ;;  %v1098_v45 = vpop.permute.xlu1 %1097 }
 0x287   : > { %v4375_v42 = vpop.f32.mrb[7].mxu0 }
 0x28a   : > { %3527 = vmatmul.mubr.msk.bf16.vlgmr.msra.gmra.mrb[8].mxu0 %vm1033_vm8, %v4348_v28  ;;  %3535 = vmatmul.mubr.msk.bf16.vlgmr.msra.gmra.mrb[12].mxu1 %vm1033_vm8, %v1098_v45 }
 0x35d   : > { %v3528_v46 = vpop.f32.mrb[8].mxu0  ;;  %v3536_v47 = vpop.f32.mrb[12].mxu1 }
 0x35e   : > { %v1166_v48 = vsel %vm775_vm9, %v3536_v47, %v3528_v46  ;;  %v1080_v51 = vpop.f32.mrb[9].mxu0  ;;  %v1149_v53 = vpop.f32.mrb[13].mxu1 }
 0x35f   : > { %v1164_v55 = vsel %vm773_vm10, %v1149_v53, %v1080_v51  ;;  %v3529_v56 = vpop.f32.mrb[10].mxu0  ;;  %v3537_v57 = vpop.f32.mrb[14].mxu1  ;;  %v1170_v58 = vadd.f32 %v4368_v38, %v1166_v48 }
 0x360   : > { %v1167_v59 = vsel %vm776_vm11, %v3537_v57, %v3529_v56  ;;  %v1083_v60 = vpop.f32.mrb[11].mxu0  ;;  %v1152_v61 = vpop.f32.mrb[15].mxu1  ;;  %v1168_v62 = vadd.f32 %v1164_v55, %v4370_v39 }
 0x361   : > { %v1165_v63 = vsel %vm774_vm12, %v1152_v61, %v1083_v60  ;;  %v1171_v2 = vadd.f32 %v4373_v41, %v1167_v59  ;;  %v1178_v7 = vsel %vm963_vm6, %v1170_v58, -inf }
 0x362   : > { %v1172_v4 = vsel %vm963_vm6, %v1168_v62, -inf  ;;  %v1169_v5 = vadd.f32 %v1165_v63, %v4375_v42 }
 0x363   : > { %1173 = vmax.xlane.f32.xlu0 %v1172_v4  ;;  %v1181_v8 = vsel %vm963_vm6, %v1171_v2, -inf }
 0x364   : > { %v1175_v6 = vsel %vm963_vm6, %v1169_v5, -inf }
 0x365   : > { %1176 = vmax.xlane.f32.xlu1 %v1175_v6 }
 0x367   : > { %1179 = vmax.xlane.f32.xlu0 %v1178_v7 }
 0x36b   : > { %1182 = vmax.xlane.f32.xlu0 %v1181_v8 }
 0x376   : > { %1218 = vrot.lane.b32.xlu1 %v4338_v14, %s4940_s26 }
 0x3f0   : > { %v1174_v9 = vpop.xlane.xlu0 %1173 }
 0x3f1   : > { %v1184_v11 = vsub.f32 %v1168_v62, %v1174_v9 }
 0x3f2   : > { %v1177_v10 = vpop.xlane.xlu1 %1176 }
 0x3f3   : > { %v1188_v17 = vmul.f32 1.442695, %v1184_v11  ;;  %v1185_v18 = vsub.f32 %v1169_v5, %v1177_v10 }
 0x3f4   : > { %v1180_v12 = vpop.xlane.xlu0 %1179 }
 0x3f5   : > { %v1186_v13 = vsub.f32 %v1170_v58, %v1180_v12  ;;  %v1190_v25 = vmul.f32 1.442695, %v1185_v18 }
 0x3f6   : > { %v1219_v16 = vpop.permute.xlu1 %1218 }
 0x3f7   : > { %v1192_v19 = vmul.f32 1.442695, %v1186_v13  ;;  %3538 = vmatprep.subr.bf16.mxu0 %v1219_v16 }
 0x3f8   : > { %v1183_v23 = vpop.xlane.xlu0 %1182  ;;  %3539 = vmatpush3.bf16.msra.mxu0 %v1219_v16 }
 0x3f9   : > { %3805 = vpow2.f32 %v1192_v19  ;;  %v1187_v24 = vsub.f32 %v1171_v2, %v1183_v23 }
 0x3fa   : > { %3807 = vpow2.f32 %v1188_v17 }
 0x3fb   : > { %v1194_v27 = vmul.f32 1.442695, %v1187_v24 }
 0x3fd   : > { %3809 = vpow2.f32 %v1194_v27 }
 0x3fe   : > { %3811 = vpow2.f32 %v1190_v25 }
 0x403   : > { %v3806_v30 = vpop.eup %3805 }
 0x404   : > { %v1202_v31 = vsel %vm963_vm6, %v3806_v30, 0.0  ;;  %v3808_v32 = vpop.eup %3807 }
 0x405   : > { %1203 = vadd.xlane.f32.xlu1 %v1202_v31  ;;  %v1196_v35 = vsel %vm963_vm6, %v3808_v32, 0.0 }
 0x407   : > { %v3810_v33 = vpop.eup %3809 }
 0x408   : > { %v1205_v34 = vsel %vm963_vm6, %v3810_v33, 0.0  ;;  %v3812_v36 = vpop.eup %3811 }
 0x409   : > { %1206 = vadd.xlane.f32.xlu0 %v1205_v34  ;;  %1197 = vadd.xlane.f32.xlu1 %v1196_v35  ;;  %v1199_v37 = vsel %vm963_vm6, %v3812_v36, 0.0 }
 0x40d   : > { %1200 = vadd.xlane.f32.xlu0 %v1199_v37 }
 0x41a   : > { %1285 = vrot.lane.b32.xlu1 %v4338_v14, %s4938_s3 }
 0x41e   : > { %1352 = vrot.lane.b32.xlu1 %v4340_v15, %s4944_s25 }
 0x422   : > { %1354 = vrot.lane.b32.xlu1 %v4350_v29, %s4944_s25  ;;  %s4981_s25 = smov 32  }
 0x423   : > { %1220 = vrot.lane.b32.xlu0 %v4348_v28, %s4940_s26  ;;  %s4982_s26 = smov 48  }
 0x426   : > { %1283 = vrot.lane.b32.xlu1 %v4348_v28, %s4936_s23 }
 0x427   : > { %1287 = vrot.lane.b32.xlu0 %v4348_v28, %s4938_s3  ;;  %s4983_s3 = smov 16  }
 0x42b   : > { %1281 = vrot.lane.b32.xlu0 %v4338_v14, %s4936_s23 }
 0x492   : > { %v1204_v40 = vpop.xlane.xlu1 %1203 }
 0x496   : > { %v1207_v45 = vpop.xlane.xlu0 %1206  ;;  %v1198_v46 = vpop.xlane.xlu1 %1197 }
 0x497   : > { %3813 = vrcp.f32 %v1207_v45 }
 0x498   : > { %3815 = vrcp.f32 %v1198_v46 }
 0x499   : > { %3817 = vrcp.f32 %v1204_v40 }
 0x49a   : > { %v1201_v47 = vpop.xlane.xlu0 %1200  ;;  %v1286_v48 = vpop.permute.xlu1 %1285 }
 0x49b   : > { %3819 = vrcp.f32 %v1201_v47  ;;  %v1296_v51 = vsel %vm1033_vm8, %v1286_v48, 0  ;;  %3697 = vmatprep.subr.msk.bf16.mxu1 %vm1033_vm8, %v1286_v48 }
 0x49c   : > { %3547 = vmatpush3.bf16.xpose.msra.mxu1 %v1296_v51 }
 0x49e   : > { %v1221_v53 = vpop.permute.xlu0 %1220  ;;  %v1353_v55 = vpop.permute.xlu1 %1352 }
 0x49f   : > { %3540 = vmatprep.subr.bf16.mxu0 %v1221_v53  ;;  %v1363_v10 = vsel %vm1033_vm8, %v1353_v55, 0 }
 0x4a0   : > { %3541 = vmatpush3.bf16.msra.mxu0 %v1221_v53 }
 0x4a1   : > { %3699 = vmatprep.subr.msk.bf16.mxu0 %vm1033_vm8, %v1353_v55  ;;  %v3814_v56 = vpop.eup %3813 }
 0x4a2   : > { %v1288_v57 = vpop.permute.xlu0 %1287  ;;  %v3816_v58 = vpop.eup %3815  ;;  %v1215_v63 = vmul.f32 %v3814_v56, %v3810_v33 }
 0x4a3   : > { %v1299_v59 = vsel %vm1033_vm8, %v1288_v57, 0  ;;  %3698 = vmatprep.subr.msk.bf16.mxu1 %vm1033_vm8, %v1288_v57  ;;  %v3818_v60 = vpop.eup %3817  ;;  %v1355_v61 = vpop.permute.xlu1 %1354  ;;  %v1212_v4 = vmul.f32 %v3816_v58, %v3808_v32 }
 0x4a4   : > { %3549 = vmatpush3.bf16.xpose.msra.mxu1 %v1299_v59  ;;  %v1214_v6 = vmul.f32 %v3818_v60, %v3806_v30  ;;  %v1366_v11 = vsel %vm1033_vm8, %v1355_v61, 0 }
 0x4a5   : > { %v3820_v62 = vpop.eup %3819 }
 0x4a6   : > { %v1282_v2 = vpop.permute.xlu0 %1281  ;;  %v1213_v5 = vmul.f32 %v3820_v62, %v3812_v36  ;;  %v1217_v8 = vpack.c.bf16 %v1215_v63, %v1214_v6 }
 0x4a7   : > { %3550 = vmatprep.mubr.msk.bf16.mxu1 %vm1033_vm8, %v1282_v2  ;;  %v1284_v9 = vpop.permute.xlu1 %1283 }
 0x4a8   : > { %v1216_v7 = vpack.c.bf16 %v1213_v5, %v1212_v4 }
 0x4aa   : > { %3542 = vmatprep.mubr.msk.bf16.mxu0 %vm963_vm6, %v1216_v7 }
 0x4ab   : > { %3543 = vmatmul.mubr.msk.bf16.vlgmr.msra.gmra.mrb[12].mxu0 %vm963_vm6, %v1217_v8  ;;  %3551 = vmatmul.mubr.msk.bf16.vlgmr.msra.gmra.mrb[16].mxu1 %vm1033_vm8, %v1284_v9 }
 0x4ac   : > { %3555 = vmatpush3.bf16.xpose.msra.mxu0 %v1363_v10  ;;  %3558 = vmatprep.mubr.msk.bf16.mxu0 %vm1033_vm8, %v4340_v15 }
 0x4ad   : > { %3700 = vmatprep.subr.msk.bf16.mxu0 %vm1033_vm8, %v1355_v61 }
 0x4b4   : > { %3557 = vmatpush3.bf16.xpose.msra.mxu0 %v1366_v11 }
 0x4bb   : > { %3559 = vmatmul.mubr.msk.bf16.vlgmr.msra.gmra.mrb[16].mxu0 %vm1033_vm8, %v4350_v29 }
 0x57e   : > { %v4444_v12 = vpop.f32.mrb[12].mxu0  ;;  %v3552_v13 = vpop.f32.mrb[16].mxu1 }
 0x57f   : > { %v4446_v16 = vpop.f32.mrb[13].mxu0  ;;  %v1335_v17 = vpop.f32.mrb[17].mxu1 }
 0x580   : > { %v4448_v18 = vpop.f32.mrb[14].mxu0  ;;  %v3553_v19 = vpop.f32.mrb[18].mxu1 }
 0x581   : > { %v1280_v15 = vpack.c.bf16 %v4448_v18, %v4444_v12  ;;  %v4452_v23 = vpop.f32.mrb[15].mxu0  ;;  %v1338_v24 = vpop.f32.mrb[19].mxu1 }
 0x582   : > { %v1279_v25 = vpack.c.bf16 %v4452_v23, %v4446_v16 }
 0x58e   : > { %v3560_v27 = vpop.f32.mrb[16].mxu0 }
 0x58f   : > { %v1419_v29 = vsel %vm775_vm9, %v3560_v27, %v3552_v13  ;;  %v1402_v30 = vpop.f32.mrb[17].mxu0 }
 0x590   : > { %v1417_v31 = vsel %vm773_vm10, %v1402_v30, %v1335_v17  ;;  %v3561_v32 = vpop.f32.mrb[18].mxu0  ;;  %v1423_v33 = vadd.f32 %v4368_v38, %v1419_v29  ;;  %v3783_v17 = vld [vmem:[%s4910_s9 + $0x8] sm:$0xff]  }
 0x591   : > { %v1420_v34 = vsel %vm776_vm11, %v3561_v32, %v3553_v19  ;;  %v1405_v35 = vpop.f32.mrb[19].mxu0  ;;  %v1421_v36 = vadd.f32 %v1417_v31, %v4370_v39  ;;  %3570 = vmatprep.subr.bf16.mxu0 %v3783_v17 }
 0x592   : > { %v1418_v37 = vsel %vm774_vm12, %v1405_v35, %v1338_v24  ;;  %v1424_v40 = vadd.f32 %v4373_v41, %v1420_v34  ;;  %v1431_v48 = vsel %vm963_vm6, %v1423_v33, -inf  ;;  %3571 = vmatpush3.bf16.msra.mxu0 %v3783_v17 }
 0x593   : > { %v1425_v45 = vsel %vm963_vm6, %v1421_v36, -inf  ;;  %v1422_v46 = vadd.f32 %v1418_v37, %v4375_v42 }
 0x594   : > { %1426 = vmax.xlane.f32.xlu0 %v1425_v45  ;;  %v1434_v51 = vsel %vm963_vm6, %v1424_v40, -inf }
 0x595   : > { %v1428_v47 = vsel %vm963_vm6, %v1422_v46, -inf }
 0x596   : > { %1429 = vmax.xlane.f32.xlu1 %v1428_v47 }
 0x598   : > { %1432 = vmax.xlane.f32.xlu0 %v1431_v48 }
 0x59c   : > { %1435 = vmax.xlane.f32.xlu0 %v1434_v51 }
 0x621   : > { %v1427_v53 = vpop.xlane.xlu0 %1426 }
 0x622   : > { %v1437_v55 = vsub.f32 %v1421_v36, %v1427_v53 }
 0x623   : > { %v1430_v56 = vpop.xlane.xlu1 %1429 }
 0x624   : > { %v1441_v59 = vmul.f32 1.442695, %v1437_v55  ;;  %v1438_v60 = vsub.f32 %v1422_v46, %v1430_v56  ;;  %v3784_v46 = vld [vmem:[%s4910_s9] sm:$0xff]  }
 0x625   : > { %v1433_v57 = vpop.xlane.xlu0 %1432  ;;  %3576 = vmatprep.subr.bf16.mxu0 %v3784_v46 }
 0x626   : > { %v1439_v58 = vsub.f32 %v1423_v33, %v1433_v57  ;;  %v1443_v2 = vmul.f32 1.442695, %v1438_v60 }
 0x628   : > { %v1445_v61 = vmul.f32 1.442695, %v1439_v58 }
 0x629   : > { %v1436_v62 = vpop.xlane.xlu0 %1435 }
 0x62a   : > { %3821 = vpow2.f32 %v1445_v61  ;;  %v1440_v63 = vsub.f32 %v1424_v40, %v1436_v62 }
 0x62b   : > { %3823 = vpow2.f32 %v1441_v59  ;;  %v3320_v59 = vld [vmem:[%s4911_s10] ss:$0 sm:$0xff] }
 0x62c   : > { %v1447_v4 = vmul.f32 1.442695, %v1440_v63 }
 0x62e   : > { %3825 = vpow2.f32 %v1447_v4 }
 0x62f   : > { %3827 = vpow2.f32 %v1443_v2 }
 0x634   : > { %v3822_v5 = vpop.eup %3821 }
 0x635   : > { %v1455_v6 = vsel %vm963_vm6, %v3822_v5, 0.0  ;;  %v3824_v7 = vpop.eup %3823 }
 0x636   : > { %1456 = vadd.xlane.f32.xlu1 %v1455_v6  ;;  %v1449_v10 = vsel %vm963_vm6, %v3824_v7, 0.0 }
 0x638   : > { %v3826_v8 = vpop.eup %3825 }
 0x639   : > { %v1458_v9 = vsel %vm963_vm6, %v3826_v8, 0.0  ;;  %v3828_v11 = vpop.eup %3827 }
 0x63a   : > { %1459 = vadd.xlane.f32.xlu0 %v1458_v9  ;;  %1450 = vadd.xlane.f32.xlu1 %v1449_v10  ;;  %v1452_v13 = vsel %vm963_vm6, %v3828_v11, 0.0 }
 0x63e   : > { %1453 = vadd.xlane.f32.xlu0 %v1452_v13 }
 0x64b   : > { %1471 = vrot.lane.b32.xlu1 %v4338_v14, %s4934_s24 }
 0x654   : > { %1473 = vrot.lane.b32.xlu0 %v4348_v28, %s4934_s24 }
 0x6c3   : > { %v1457_v19 = vpop.xlane.xlu1 %1456 }
 0x6c7   : > { %v1460_v24 = vpop.xlane.xlu0 %1459  ;;  %v1451_v27 = vpop.xlane.xlu1 %1450 }
 0x6c8   : > { %3829 = vrcp.f32 %v1460_v24 }
 0x6c9   : > { %3831 = vrcp.f32 %v1451_v27 }
 0x6ca   : > { %3833 = vrcp.f32 %v1457_v19 }
 0x6cb   : > { %v1454_v29 = vpop.xlane.xlu0 %1453  ;;  %v1472_v30 = vpop.permute.xlu1 %1471 }
 0x6cc   : > { %3835 = vrcp.f32 %v1454_v29  ;;  %3562 = vmatprep.subr.bf16.mxu1 %v1472_v30 }
 0x6cd   : > { %3563 = vmatpush3.bf16.msra.mxu1 %v1472_v30 }
 0x6cf   : > { %v1474_v14 = vpop.permute.xlu0 %1473 }
 0x6d0   : > { %3564 = vmatprep.subr.bf16.mxu1 %v1474_v14 }
 0x6d1   : > { %3565 = vmatpush3.bf16.msra.mxu1 %v1474_v14 }
 0x6d2   : > { %v3830_v28 = vpop.eup %3829 }
 0x6d3   : > { %v3832_v31 = vpop.eup %3831  ;;  %v1468_v34 = vmul.f32 %v3830_v28, %v3826_v8 }
 0x6d4   : > { %v3834_v32 = vpop.eup %3833  ;;  %v1465_v35 = vmul.f32 %v3832_v31, %v3824_v7 }
 0x6d5   : > { %v1467_v37 = vmul.f32 %v3834_v32, %v3822_v5 }
 0x6d6   : > { %v3836_v33 = vpop.eup %3835 }
 0x6d7   : > { %v1466_v36 = vmul.f32 %v3836_v33, %v3828_v11  ;;  %v1470_v45 = vpack.c.bf16 %v1468_v34, %v1467_v37  ;;  %v3785_v33 = vld [vmem:[%s4912_s11] sm:$0xff]   ;;  %v3786_v34 = vld [vmem:[%s4912_s11 + $0x8] sm:$0xff]  }
 0x6d8   : > { %3582 = vmatprep.subr.bf16.mxu1 %v3785_v33 }
 0x6d9   : > { %v1469_v40 = vpack.c.bf16 %v1466_v36, %v1465_v35  ;;  %v3787_v35 = vld [vmem:[%s4914_s13] sm:$0xff]  }
 0x6db   : > { %3566 = vmatprep.mubr.msk.bf16.mxu1 %vm963_vm6, %v1469_v40 }
 0x6dc   : > { %3567 = vmatmul.mubr.msk.bf16.vlgmr.msra.gmra.mrb[20].mxu1 %vm963_vm6, %v1470_v45 }
 0x6dd   : > { %3583 = vmatpush3.bf16.msra.mxu1 %v3785_v33 }
 0x6de   : > { %3584 = vmatprep.subr.bf16.mxu1 %v3786_v34 }
 0x6e1   : > { %3585 = vmatpush3.bf16.msra.mxu1 %v3786_v34 }
 0x6e2   : > { %3590 = vmatprep.subr.bf16.mxu1 %v3787_v35 }
 0x7af   : > { %v3568_v47 = vpop.f32.mrb[20].mxu1 }
 0x7b0   : > { %v1517_v48 = vpop.f32.mrb[21].mxu1 }
 0x7b1   : > { %v3569_v51 = vpop.f32.mrb[22].mxu1 }
 0x7b2   : > { %v1533_v53 = vpack.c.bf16 %v3569_v51, %v3568_v47  ;;  %v1520_v55 = vpop.f32.mrb[23].mxu1 }
 0x7b3   : > { %v1532_v56 = vpack.c.bf16 %v1520_v55, %v1517_v48 }
 0x7b5   : > { %3572 = vmatprep.mubr.msk.bf16.mxu0 %vm1033_vm8, %v1532_v56 }
 0x7b6   : > { %3573 = vmatmul.mubr.msk.bf16.vlgmr.msra.gmra.mrb[20].mxu0 %vm1033_vm8, %v1533_v53 }
 0x7b7   : > { %3577 = vmatpush3.bf16.msra.mxu0 %v3784_v46  ;;  %3578 = vmatprep.mubr.msk.bf16.mxu0 %vm1033_vm8, %v1279_v25 }
 0x7c2   : > { %3579 = vmatmul.mubr.msk.bf16.vlgmr.msra.gmra.mrb[20].mxu0 %vm1033_vm8, %v1280_v15 }
 0x7c3   : > { %2089 = vmatprep.mubr.bf16.mxu0 %v4030_v0 }
 0x895   : > { %v3580_v57 = vpop.f32.mrb[20].mxu0 }
 0x896   : > { %v1641_v58 = vpop.f32.mrb[21].mxu0  ;;  %v1658_v60 = vadd.f32 %v3580_v57, %v4320_v54 }
 0x897   : > { %v1656_v61 = vadd.f32 %v1641_v58, %v4298_v43  ;;  %v3581_v16 = vpop.f32.mrb[22].mxu0 }
 0x898   : > { %v1644_v23 = vpop.f32.mrb[23].mxu0  ;;  %v1659_v25 = vadd.f32 %v3581_v16, %v4316_v52  ;;  %v1668_v63 = vadd.f32 %v3320_v59, %v1658_v60 }
 0x899   : > { %v1657_v12 = vadd.f32 %v1644_v23, %v4300_v44  ;;  %v1666_v18 = vadd.f32 %v3320_v59, %v1656_v61 }
 0x89a   : > { %v1669_v4 = vadd.f32 %v3320_v59, %v1659_v25  ;;  %v1678_v54 = vsel %vm963_vm6, %v1668_v63, 0.0 }
 0x89b   : > { %v1672_v15 = vsel %vm963_vm6, %v1666_v18, 0.0  ;;  %v1667_v62 = vadd.f32 %v3320_v59, %v1657_v12  ;;  %v3321_v59 = vld [vmem:[%s4916_s15] ss:$0 sm:$0xff] }
 0x89c   : > { %1673 = vadd.xlane.f32.xlu1 %v1672_v15  ;;  %v1681_v43 = vsel %vm963_vm6, %v1669_v4, 0.0  ;;  %v3322_v12 = vld [vmem:[%s4917_s16] ss:$0 sm:$0xff] }
 0x89d   : > { %v1675_v2 = vsel %vm963_vm6, %v1667_v62, 0.0 }
 0x89e   : > { %1676 = vadd.xlane.f32.xlu0 %v1675_v2 }
 0x8a0   : > { %1679 = vadd.xlane.f32.xlu1 %v1678_v54 }
 0x8a2   : > { %1682 = vadd.xlane.f32.xlu0 %v1681_v43 }
 0x929   : > { %v1674_v5 = vpop.xlane.xlu1 %1673 }
 0x92a   : > { %v1685_v52 = vmul.f32 0.03125, %v1674_v5 }
 0x92b   : > { %v1677_v6 = vpop.xlane.xlu0 %1676 }
 0x92c   : > { %v1689_v44 = vsub.f32 %v1666_v18, %v1685_v52  ;;  %v1686_v7 = vmul.f32 0.03125, %v1677_v6 }
 0x92d   : > { %v1680_v8 = vpop.xlane.xlu1 %1679 }
 0x92e   : > { %v1690_v9 = vsub.f32 %v1667_v62, %v1686_v7  ;;  %v1687_v10 = vmul.f32 0.03125, %v1680_v8  ;;  %v1693_v11 = vmul.f32 %v1689_v44, %v1689_v44  ;;  %v3788_v7 = vld [vmem:[%s4914_s13 + $0x8] sm:$0xff]   ;;  %v3789_v8 = vld [vmem:[%s4914_s13 + $0x10] sm:$0xff]  }
 0x92f   : > { %v1683_v13 = vpop.xlane.xlu0 %1682 }
 0x930   : > { %v1691_v17 = vsub.f32 %v1668_v63, %v1687_v10  ;;  %v1688_v19 = vmul.f32 0.03125, %v1683_v13  ;;  %v1697_v24 = vsel %vm963_vm6, %v1693_v11, 0.0  ;;  %v1694_v27 = vmul.f32 %v1690_v9, %v1690_v9  ;;  %v3323_v10 = vld [vmem:[%s4913_s12] ss:$0 sm:$0xff] }
 0x931   : > { %1698 = vadd.xlane.f32.xlu1 %v1697_v24 }
 0x932   : > { %v1692_v29 = vsub.f32 %v1669_v4, %v1688_v19  ;;  %v1700_v30 = vsel %vm963_vm6, %v1694_v27, 0.0  ;;  %v1695_v14 = vmul.f32 %v1691_v17, %v1691_v17 }
 0x933   : > { %1701 = vadd.xlane.f32.xlu0 %v1700_v30 }
 0x934   : > { %v1703_v28 = vsel %vm963_vm6, %v1695_v14, 0.0  ;;  %v1696_v31 = vmul.f32 %v1692_v29, %v1692_v29 }
 0x935   : > { %1704 = vadd.xlane.f32.xlu1 %v1703_v28 }
 0x936   : > { %v1706_v32 = vsel %vm963_vm6, %v1696_v31, 0.0 }
 0x937   : > { %1707 = vadd.xlane.f32.xlu0 %v1706_v32 }
 0x9be   : > { %v1699_v36 = vpop.xlane.xlu1 %1698 }
 0x9bf   : > { %v1709_v37 = vmul.f32 0.03125, %v1699_v36 }
 0x9c0   : > { %v1702_v40 = vpop.xlane.xlu0 %1701 }
 0x9c1   : > { %v1713_v45 = vadd.f32 1e-05, %v1709_v37  ;;  %v1710_v46 = vmul.f32 0.03125, %v1702_v40 }
 0x9c2   : > { %v1705_v47 = vpop.xlane.xlu1 %1704 }
 0x9c3   : > { %3837 = vrsqrt.f32 %v1713_v45  ;;  %v1714_v48 = vadd.f32 1e-05, %v1710_v46  ;;  %v1711_v51 = vmul.f32 0.03125, %v1705_v47 }
 0x9c4   : > { %v1708_v53 = vpop.xlane.xlu0 %1707 }
 0x9c5   : > { %3839 = vrsqrt.f32 %v1714_v48  ;;  %v1715_v55 = vadd.f32 1e-05, %v1711_v51  ;;  %v1712_v56 = vmul.f32 0.03125, %v1708_v53 }
 0x9c7   : > { %3841 = vrsqrt.f32 %v1715_v55  ;;  %v1716_v57 = vadd.f32 1e-05, %v1712_v56 }
 0x9c9   : > { %3843 = vrsqrt.f32 %v1716_v57 }
 0x9cd   : > { %v3838_v58 = vpop.eup %3837 }
 0x9ce   : > { %v1721_v60 = vmul.f32 %v3838_v58, %v1689_v44 }
 0x9cf   : > { %v3840_v61 = vpop.eup %3839 }
 0x9d0   : > { %v1722_v16 = vmul.f32 %v3840_v61, %v1690_v9  ;;  %v1731_v23 = vmul.f32 %v3321_v59, %v1721_v60  ;;  %v3790_v9 = vld [vmem:[%s4914_s13 + $0x18] sm:$0xff]  }
 0x9d1   : > { %v3842_v25 = vpop.eup %3841 }
 0x9d2   : > { %v1723_v18 = vmul.f32 %v3842_v25, %v1691_v17  ;;  %v1732_v15 = vmul.f32 %v3321_v59, %v1722_v16  ;;  %v1741_v4 = vadd.f32 %v3322_v12, %v1731_v23 }
 0x9d3   : > { %v3844_v62 = vpop.eup %3843 }
 0x9d4   : > { %v1733_v63 = vmul.f32 %v3321_v59, %v1723_v18  ;;  %v1724_v2 = vmul.f32 %v3844_v62, %v1692_v29  ;;  %v1742_v54 = vadd.f32 %v3322_v12, %v1732_v15 }
 0x9d6   : > { %v1734_v43 = vmul.f32 %v3321_v59, %v1724_v2  ;;  %v1745_v5 = vpack.c.bf16 %v1742_v54, %v1741_v4  ;;  %v1743_v52 = vadd.f32 %v3322_v12, %v1733_v63 }
 0x9d8   : > { %3586 = vmatprep.mubr.msk.bf16.mxu1 %vm963_vm6, %v1745_v5  ;;  %v1744_v6 = vadd.f32 %v3322_v12, %v1734_v43 }
 0x9da   : > { %v1746_v44 = vpack.c.bf16 %v1744_v6, %v1743_v52 }
 0x9dc   : > { %3587 = vmatmul.mubr.msk.bf16.vlgmr.msra.gmra.mrb[24].mxu1 %vm963_vm6, %v1746_v44 }
 0x9dd   : > { %3591 = vmatpush3.bf16.msra.mxu1 %v3787_v35  ;;  %v3328_v35 = vld [vmem:[%s4915_s14] ss:$0 sm:$0xff] }
 0x9de   : > { %3592 = vmatprep.subr.bf16.mxu1 %v3788_v7 }
 0x9e1   : > { %3593 = vmatpush3.bf16.msra.mxu1 %v3788_v7 }
 0x9e2   : > { %3594 = vmatprep.subr.bf16.mxu1 %v3789_v8 }
 0x9e5   : > { %3595 = vmatpush3.bf16.msra.mxu1 %v3789_v8 }
 0x9e6   : > { %3596 = vmatprep.subr.bf16.mxu1 %v3790_v9 }
 0x9e9   : > { %3597 = vmatpush3.bf16.msra.mxu1 %v3790_v9 }
 0xaaf   : > { %v3588_v11 = vpop.f32.mrb[24].mxu1 }
 0xab0   : > { %v1819_v13 = vadd.f32 %v3588_v11, %v3323_v10  ;;  %v1810_v17 = vpop.f32.mrb[25].mxu1  ;;  %v3793_v11 = vld [vmem:[%s4973_s7 + $0x24] ss:$8 sps:$4 sm:$0xff]  }
 0xab1   : > { %v1811_v19 = vadd.f32 %v3323_v10, %v1810_v17  ;;  %v3589_v24 = vpop.f32.mrb[26].mxu1  ;;  %2057 = vmatprep.subr.bf16.mxu0 %v3793_v11  ;;  %v3796_v17 = vld [vmem:[%s4973_s7 + $0x34] ss:$8 sps:$4 sm:$0xff]  }
 0xab2   : > { %v1822_v27 = vadd.f32 %v3589_v24, %v3323_v10  ;;  %v1813_v29 = vpop.f32.mrb[27].mxu1  ;;  %v1827_v14 = vmax.f32 %v1819_v13, 0.0  ;;  %v3791_v13 = vld [vmem:[%s4973_s7 + $0x20] ss:$8 sps:$4 sm:$0xff]  }
 0xab3   : > { %v1814_v30 = vadd.f32 %v3323_v10, %v1813_v29  ;;  %v1825_v31 = vmax.f32 %v1811_v19, 0.0  ;;  %2058 = vmatpush1.bf16.msra.mxu0 %v3791_v13  ;;  %v3794_v19 = vld [vmem:[%s4973_s7 + $0x30] ss:$8 sps:$4 sm:$0xff]  }
 0xab4   : > { %v1828_v28 = vmax.f32 %v1822_v27, 0.0  ;;  %2059 = vmatprep.subr.bf16.mxu0 %v3796_v17 }
 0xab5   : > { %v1826_v32 = vmax.f32 %v1814_v30, 0.0 }
 0xab6   : > { %v1830_v33 = vpack.c.bf16 %v1828_v28, %v1827_v14 }
 0xab7   : > { %v1829_v34 = vpack.c.bf16 %v1826_v32, %v1825_v31  ;;  %2060 = vmatpush1.bf16.msra.mxu0 %v3794_v19 }
 0xab9   : > { %3598 = vmatprep.mubr.msk.bf16.mxu1 %vm1870_vm13, %v1829_v34 }
 0xaba   : > { %3599 = vmatmul.mubr.msk.bf16.vlgmr.msra.gmra.mrb[28].mxu1 %vm1870_vm13, %v1830_v33 }
 0xb8d   : > { %v3600_v36 = vpop.f32.mrb[28].mxu1 }
 0xb8e   : > { %v1911_v37 = vpop.f32.mrb[29].mxu1  ;;  %v1920_v40 = vadd.f32 %v3600_v36, %v3328_v35 }
 0xb8f   : > { %v1912_v45 = vadd.f32 %v3328_v35, %v1911_v37  ;;  %v3601_v46 = vpop.f32.mrb[30].mxu1 }
 0xb90   : > { %v1914_v47 = vpop.f32.mrb[31].mxu1  ;;  %v1923_v48 = vadd.f32 %v3601_v46, %v3328_v35  ;;  %v1928_v57 = vadd.f32 %v1920_v40, %v1743_v52  ;;  %v3335_v40 = vld [vmem:[%s4918_s17] ss:$0 sm:$0xff] }
 0xb91   : > { %v1915_v51 = vadd.f32 %v3328_v35, %v1914_v47  ;;  %v1926_v53 = vadd.f32 %v1912_v45, %v1741_v4 }
 0xb92   : > { %v1929_v59 = vadd.f32 %v1923_v48, %v1744_v6  ;;  %v1938_v60 = vsel %vm963_vm6, %v1928_v57, 0.0 }
 0xb93   : > { %v1932_v55 = vsel %vm963_vm6, %v1926_v53, 0.0  ;;  %v1927_v56 = vadd.f32 %v1915_v51, %v1742_v54 }
 0xb94   : > { %1933 = vadd.xlane.f32.xlu1 %v1932_v55  ;;  %v1941_v61 = vsel %vm963_vm6, %v1929_v59, 0.0 }
 0xb95   : > { %v1935_v58 = vsel %vm963_vm6, %v1927_v56, 0.0 }
 0xb96   : > { %1936 = vadd.xlane.f32.xlu0 %v1935_v58 }
 0xb98   : > { %1939 = vadd.xlane.f32.xlu1 %v1938_v60 }
 0xb9a   : > { %1942 = vadd.xlane.f32.xlu0 %v1941_v61 }
 0xc21   : > { %v1934_v16 = vpop.xlane.xlu1 %1933 }
 0xc22   : > { %v1944_v23 = vmul.f32 0.03125, %v1934_v16 }
 0xc23   : > { %v1937_v25 = vpop.xlane.xlu0 %1936 }
 0xc24   : > { %v1948_v12 = vsub.f32 %v1926_v53, %v1944_v23  ;;  %v1945_v18 = vmul.f32 0.03125, %v1937_v25  ;;  %v3336_v53 = vld [vmem:[%s4919_s18] ss:$0 sm:$0xff] }
 0xc25   : > { %v1940_v15 = vpop.xlane.xlu1 %1939 }
 0xc26   : > { %v1949_v62 = vsub.f32 %v1927_v56, %v1945_v18  ;;  %v1946_v63 = vmul.f32 0.03125, %v1940_v15  ;;  %v1952_v2 = vmul.f32 %v1948_v12, %v1948_v12  ;;  %v3341_v15 = vld [vmem:[%s4977_s8 + $0x2] sm:$0x3] }
 0xc27   : > { %v1943_v4 = vpop.xlane.xlu0 %1942 }
 0xc28   : > { %v1950_v54 = vsub.f32 %v1928_v57, %v1946_v63  ;;  %v1947_v43 = vmul.f32 0.03125, %v1943_v4  ;;  %v1956_v5 = vsel %vm963_vm6, %v1952_v2, 0.0  ;;  %v1953_v52 = vmul.f32 %v1949_v62, %v1949_v62 }
 0xc29   : > { %1957 = vadd.xlane.f32.xlu1 %v1956_v5 }
 0xc2a   : > { %v1951_v6 = vsub.f32 %v1929_v59, %v1947_v43  ;;  %v1959_v44 = vsel %vm963_vm6, %v1953_v52, 0.0  ;;  %v1954_v7 = vmul.f32 %v1950_v54, %v1950_v54 }
 0xc2b   : > { %1960 = vadd.xlane.f32.xlu0 %v1959_v44 }
 0xc2c   : > { %v1962_v8 = vsel %vm963_vm6, %v1954_v7, 0.0  ;;  %v1955_v9 = vmul.f32 %v1951_v6, %v1951_v6 }
 0xc2d   : > { %1963 = vadd.xlane.f32.xlu1 %v1962_v8 }
 0xc2e   : > { %v1965_v10 = vsel %vm963_vm6, %v1955_v9, 0.0 }
 0xc2f   : > { %1966 = vadd.xlane.f32.xlu0 %v1965_v10 }
 0xcb6   : > { %v1958_v24 = vpop.xlane.xlu1 %1957 }
 0xcb7   : > { %v1968_v27 = vmul.f32 0.03125, %v1958_v24 }
 0xcb8   : > { %v1961_v29 = vpop.xlane.xlu0 %1960 }
 0xcb9   : > { %v1972_v30 = vadd.f32 1e-05, %v1968_v27  ;;  %v1969_v14 = vmul.f32 0.03125, %v1961_v29 }
 0xcba   : > { %v1964_v28 = vpop.xlane.xlu1 %1963 }
 0xcbb   : > { %3845 = vrsqrt.f32 %v1972_v30  ;;  %v1973_v31 = vadd.f32 1e-05, %v1969_v14  ;;  %v1970_v32 = vmul.f32 0.03125, %v1964_v28 }
 0xcbc   : > { %v1967_v33 = vpop.xlane.xlu0 %1966 }
 0xcbd   : > { %3847 = vrsqrt.f32 %v1973_v31  ;;  %v1974_v34 = vadd.f32 1e-05, %v1970_v32  ;;  %v1971_v35 = vmul.f32 0.03125, %v1967_v33 }
 0xcbf   : > { %3849 = vrsqrt.f32 %v1974_v34  ;;  %v1975_v36 = vadd.f32 1e-05, %v1971_v35 }
 0xcc1   : > { %3851 = vrsqrt.f32 %v1975_v36 }
 0xcc5   : > { %v3846_v37 = vpop.eup %3845 }
 0xcc6   : > { %v1980_v45 = vmul.f32 %v3846_v37, %v1948_v12 }
 0xcc7   : > { %v3848_v46 = vpop.eup %3847 }
 0xcc8   : > { %v1990_v47 = vmul.f32 %v3335_v40, %v1980_v45  ;;  %v1981_v48 = vmul.f32 %v3848_v46, %v1949_v62  ;;  %v2024_v62 = vrot.slane %v3341_v15, %v935_v1 }
 0xcc9   : > { %v3850_v51 = vpop.eup %3849 }
 0xcca   : > { %v1991_v55 = vmul.f32 %v3335_v40, %v1981_v48  ;;  %v1982_v57 = vmul.f32 %v3850_v51, %v1950_v54  ;;  %v4578_v59 = vadd.f32 %v3336_v53, %v1990_v47 }
 0xccb   : > { %v3852_v56 = vpop.eup %3851 }
 0xccc   : > { %v1983_v58 = vmul.f32 %v3852_v56, %v1951_v6  ;;  %v4580_v60 = vadd.f32 %v3336_v53, %v1991_v55  ;;  %v1992_v23 = vmul.f32 %v3335_v40, %v1982_v57 }
 0xcce   : > { %v2018_v61 = vpack.c.bf16 %v4580_v60, %v4578_v59  ;;  %v1993_v16 = vmul.f32 %v3335_v40, %v1983_v58  ;;  %v4588_v12 = vadd.f32 %v3336_v53, %v1992_v23 }
 0xcd0   : > { %3351 = vmatmul.mubr.msk.bf16.vlgmr.msra.gmra.mrb[24].mxu0 %vm963_vm6, %v2018_v61  ;;  %v4586_v25 = vadd.f32 %v3336_v53, %v1993_v16 }
 0xcd1   : > { %2099 = vmatprep.mubr.bf16.mxu0 %v4030_v0  ;;  %v2028_v0 = vrot.slane %v3341_v15, %v939_v3 }
 0xcd2   : > { %v2019_v18 = vpack.c.bf16 %v4586_v25, %v4588_v12 }
 0xcd8   : > { %3352 = vmatmul.mubr.msk.bf16.gmra.mrb[28].mxu0 %vm963_vm6, %v2019_v18 }
 0xda3   : > { %v2091_v63 = vpop.f32.mrb[24].mxu0 }
 0xda4   : > { %v2093_v2 = vpop.f32.mrb[25].mxu0  ;;  %v2092_v54 = vadd.f32 %v2091_v63, %v2024_v62 }
 0xda5   : > { %v2095_v4 = vpop.f32.mrb[26].mxu0  ;;  %v2094_v52 = vadd.f32 %v2093_v2, %v2028_v0 }
 0xda6   : > { %v2096_v43 = vadd.f32 %v2095_v4, %v2024_v62  ;;  %v2097_v5 = vpop.f32.mrb[27].mxu0 }
 0xda7   : > { %v2098_v6 = vadd.f32 %v2097_v5, %v2028_v0 }
 0xda8   : > { %v4600_v44 = vpack.c.bf16 %v2096_v43, %v2092_v54 }
 0xda9   : > { %v4602_v7 = vpack.c.bf16 %v2098_v6, %v2094_v52 }
 0xdaa   : > { %2185 = vrot.lane.b32.xlu0 %v4600_v44, %s4032_s1  ;;  %2116 = vrot.lane.b32.xlu1 %v4600_v44, %s4978_s0 }
 0xdab   : > { %3606 = vmatprep.mubr.msk.bf16.mxu0 %vm1033_vm8, %v4600_v44  ;;  %v2101_v49 = vpop.f32.mrb[28].mxu0 }
 0xdac   : > { %v2103_v1 = vpop.f32.mrb[29].mxu0  ;;  %v2102_v8 = vadd.f32 %v2101_v49, %v2024_v62 }
 0xdad   : > { %v2105_v3 = vpop.f32.mrb[30].mxu0  ;;  %v2104_v11 = vadd.f32 %v2103_v1, %v2028_v0 }
 0xdae   : > { %v2106_v9 = vadd.f32 %v2105_v3, %v2024_v62  ;;  %2181 = vrot.lane.b32.xlu0 %v4600_v44, %s4979_s21  ;;  %v2107_v10 = vpop.f32.mrb[31].mxu0 }
 0xdaf   : > { %v2108_v13 = vadd.f32 %v2107_v10, %v2028_v0 }
 0xdb0   : > { %v4612_v17 = vpack.c.bf16 %v2106_v9, %v2102_v8 }
 0xdb1   : > { %v4614_v19 = vpack.c.bf16 %v2108_v13, %v2104_v11 }
 0xdb2   : > { %2118 = vrot.lane.b32.xlu1 %v4612_v17, %s4978_s0 }
 0xdb6   : > { %2187 = vrot.lane.b32.xlu1 %v4612_v17, %s4032_s1  ;;  %s4980_s1 = smov 96  }
 0xdba   : > { %2183 = vrot.lane.b32.xlu1 %v4612_v17, %s4979_s21 }
 0xe1c   : > { %v2186_v24 = vpop.permute.xlu0 %2185  ;;  %v2117_v27 = vpop.permute.xlu1 %2116 }
 0xe1d   : > { %v2196_v29 = vsel %vm1033_vm8, %v2186_v24, 0  ;;  %v2127_v30 = vsel %vm1033_vm8, %v2117_v27, 0  ;;  %3701 = vmatprep.subr.msk.bf16.mxu0 %vm1033_vm8, %v2117_v27  ;;  %3703 = vmatprep.subr.msk.bf16.mxu1 %vm1033_vm8, %v2186_v24 }
 0xe1e   : > { %3603 = vmatpush3.bf16.xpose.msra.mxu0 %v2127_v30  ;;  %3611 = vmatpush3.bf16.xpose.msra.mxu1 %v2196_v29 }
 0xe20   : > { %v2182_v14 = vpop.permute.xlu0 %2181 }
 0xe21   : > { %3614 = vmatprep.mubr.msk.bf16.mxu1 %vm1033_vm8, %v2182_v14 }
 0xe24   : > { %v2119_v28 = vpop.permute.xlu1 %2118 }
 0xe25   : > { %v2130_v31 = vsel %vm1033_vm8, %v2119_v28, 0  ;;  %3702 = vmatprep.subr.msk.bf16.mxu0 %vm1033_vm8, %v2119_v28 }
 0xe26   : > { %3605 = vmatpush3.bf16.xpose.msra.mxu0 %v2130_v31 }
 0xe28   : > { %v2188_v32 = vpop.permute.xlu1 %2187 }
 0xe29   : > { %v2199_v33 = vsel %vm1033_vm8, %v2188_v32, 0  ;;  %3704 = vmatprep.subr.msk.bf16.mxu1 %vm1033_vm8, %v2188_v32 }
 0xe2a   : > { %3613 = vmatpush3.bf16.xpose.msra.mxu1 %v2199_v33 }
 0xe2c   : > { %v2184_v34 = vpop.permute.xlu1 %2183 }
 0xe2d   : > { %3607 = vmatmul.mubr.msk.bf16.vlgmr.msra.gmra.mrb[32].mxu0 %vm1033_vm8, %v4612_v17 }
 0xe31   : > { %3615 = vmatmul.mubr.msk.bf16.vlgmr.msra.gmra.mrb[32].mxu1 %vm1033_vm8, %v2184_v34 }
 0xf00   : > { %v3608_v35 = vpop.f32.mrb[32].mxu0 }
 0xf01   : > { %v2166_v36 = vpop.f32.mrb[33].mxu0 }
 0xf02   : > { %v3609_v37 = vpop.f32.mrb[34].mxu0 }
 0xf03   : > { %v2169_v40 = vpop.f32.mrb[35].mxu0 }
 0xf04   : > { %v3616_v45 = vpop.f32.mrb[32].mxu1 }
 0xf05   : > { %v2252_v46 = vsel %vm775_vm9, %v3616_v45, %v3608_v35  ;;  %v2235_v47 = vpop.f32.mrb[33].mxu1 }
 0xf06   : > { %v2250_v48 = vsel %vm773_vm10, %v2235_v47, %v2166_v36  ;;  %v3617_v51 = vpop.f32.mrb[34].mxu1  ;;  %v2256_v53 = vadd.f32 %v4368_v38, %v2252_v46 }
 0xf07   : > { %v2253_v55 = vsel %vm776_vm11, %v3617_v51, %v3609_v37  ;;  %v2238_v56 = vpop.f32.mrb[35].mxu1  ;;  %v2254_v57 = vadd.f32 %v2250_v48, %v4370_v39 }
 0xf08   : > { %v2251_v58 = vsel %vm774_vm12, %v2238_v56, %v2169_v40  ;;  %v2257_v61 = vadd.f32 %v4373_v41, %v2253_v55  ;;  %v2264_v15 = vsel %vm963_vm6, %v2256_v53, -inf }
 0xf09   : > { %v2258_v16 = vsel %vm963_vm6, %v2254_v57, -inf  ;;  %v2255_v23 = vadd.f32 %v2251_v58, %v4375_v42 }
 0xf0a   : > { %2259 = vmax.xlane.f32.xlu0 %v2258_v16  ;;  %v2267_v62 = vsel %vm963_vm6, %v2257_v61, -inf }
 0xf0b   : > { %v2261_v18 = vsel %vm963_vm6, %v2255_v23, -inf }
 0xf0c   : > { %2262 = vmax.xlane.f32.xlu1 %v2261_v18 }
 0xf0e   : > { %2265 = vmax.xlane.f32.xlu0 %v2264_v15 }
 0xf12   : > { %2268 = vmax.xlane.f32.xlu0 %v2267_v62 }
 0xf1d   : > { %2304 = vrot.lane.b32.xlu1 %v4600_v44, %s4980_s1 }
 0xf97   : > { %v2260_v63 = vpop.xlane.xlu0 %2259 }
 0xf98   : > { %v2270_v2 = vsub.f32 %v2254_v57, %v2260_v63 }
 0xf99   : > { %v2263_v0 = vpop.xlane.xlu1 %2262 }
 0xf9a   : > { %v2274_v5 = vmul.f32 1.442695, %v2270_v2  ;;  %v2271_v52 = vsub.f32 %v2255_v23, %v2263_v0 }
 0xf9b   : > { %v2266_v4 = vpop.xlane.xlu0 %2265 }
 0xf9c   : > { %v2272_v54 = vsub.f32 %v2256_v53, %v2266_v4  ;;  %v2276_v3 = vmul.f32 1.442695, %v2271_v52 }
 0xf9d   : > { %v2305_v43 = vpop.permute.xlu1 %2304 }
 0xf9e   : > { %v2278_v6 = vmul.f32 1.442695, %v2272_v54  ;;  %3618 = vmatprep.subr.bf16.mxu0 %v2305_v43 }
 0xf9f   : > { %v2269_v49 = vpop.xlane.xlu0 %2268  ;;  %3619 = vmatpush3.bf16.msra.mxu0 %v2305_v43 }
 0xfa0   : > { %3853 = vpow2.f32 %v2278_v6  ;;  %v2273_v1 = vsub.f32 %v2257_v61, %v2269_v49 }
 0xfa1   : > { %3855 = vpow2.f32 %v2274_v5 }
 0xfa2   : > { %v2280_v8 = vmul.f32 1.442695, %v2273_v1 }
 0xfa4   : > { %3857 = vpow2.f32 %v2280_v8 }
 0xfa5   : > { %3859 = vpow2.f32 %v2276_v3 }
 0xfaa   : > { %v3854_v9 = vpop.eup %3853 }
 0xfab   : > { %v2288_v10 = vsel %vm963_vm6, %v3854_v9, 0.0  ;;  %v3856_v11 = vpop.eup %3855 }
 0xfac   : > { %2289 = vadd.xlane.f32.xlu1 %v2288_v10  ;;  %v2282_v27 = vsel %vm963_vm6, %v3856_v11, 0.0 }
 0xfae   : > { %v3858_v13 = vpop.eup %3857 }
 0xfaf   : > { %v2291_v24 = vsel %vm963_vm6, %v3858_v13, 0.0  ;;  %v3860_v29 = vpop.eup %3859 }
 0xfb0   : > { %2292 = vadd.xlane.f32.xlu0 %v2291_v24  ;;  %2283 = vadd.xlane.f32.xlu1 %v2282_v27  ;;  %v2285_v30 = vsel %vm963_vm6, %v3860_v29, 0.0 }
 0xfb4   : > { %2286 = vadd.xlane.f32.xlu0 %v2285_v30 }
 0xfc1   : > { %2371 = vrot.lane.b32.xlu1 %v4600_v44, %s4981_s25 }
 0xfc5   : > { %2438 = vrot.lane.b32.xlu1 %v4602_v7, %s4978_s0 }
 0xfc9   : > { %2440 = vrot.lane.b32.xlu1 %v4614_v19, %s4978_s0 }
 0xfca   : > { %2306 = vrot.lane.b32.xlu0 %v4612_v17, %s4980_s1 }
 0xfcd   : > { %2369 = vrot.lane.b32.xlu1 %v4612_v17, %s4982_s26 }
 0xfce   : > { %2373 = vrot.lane.b32.xlu0 %v4612_v17, %s4981_s25  ;;  %s3414_s25 = sshll.u32 %s4169_s2, 9 }
 0xfcf   : > { %s4821_s0 = scalar_lea.hbm %s4920_s19, %s3414_s25  ;;  %s4039_s25 = smov [#allocation5]  }
 0xfd0   : > { %s3933_s23 = sshll.u32 %s4039_s25, 4  ;;  %s3934_s23 = int_to_ptr.vmem [resolvable:$false] %s3933_s23 }
 0xfd1   : > { %s3935_s24 = scalar_lea.vmem %s3934_s23, 1024 }
 0xfd2   : > { %2367 = vrot.lane.b32.xlu0 %v4600_v44, %s4982_s26 }
0x1039   : > { %v2290_v14 = vpop.xlane.xlu1 %2289 }
0x103d   : > { %v2293_v28 = vpop.xlane.xlu0 %2292  ;;  %v2284_v31 = vpop.xlane.xlu1 %2283 }
0x103e   : > { %3861 = vrcp.f32 %v2293_v28 }
0x103f   : > { %3863 = vrcp.f32 %v2284_v31 }
0x1040   : > { %3865 = vrcp.f32 %v2290_v14 }
0x1041   : > { %v2287_v32 = vpop.xlane.xlu0 %2286  ;;  %v2372_v33 = vpop.permute.xlu1 %2371 }
0x1042   : > { %3867 = vrcp.f32 %v2287_v32  ;;  %v2382_v34 = vsel %vm1033_vm8, %v2372_v33, 0  ;;  %3705 = vmatprep.subr.msk.bf16.mxu1 %vm1033_vm8, %v2372_v33 }
0x1043   : > { %3627 = vmatpush3.bf16.xpose.msra.mxu1 %v2382_v34 }
0x1045   : > { %v2307_v35 = vpop.permute.xlu0 %2306  ;;  %v2439_v36 = vpop.permute.xlu1 %2438 }
0x1046   : > { %3620 = vmatprep.subr.bf16.mxu0 %v2307_v35  ;;  %v2449_v18 = vsel %vm1033_vm8, %v2439_v36, 0 }
0x1047   : > { %3621 = vmatpush3.bf16.msra.mxu0 %v2307_v35 }
0x1048   : > { %3707 = vmatprep.subr.msk.bf16.mxu0 %vm1033_vm8, %v2439_v36  ;;  %v3862_v37 = vpop.eup %3861 }
0x1049   : > { %v2374_v40 = vpop.permute.xlu0 %2373  ;;  %v3864_v45 = vpop.eup %3863  ;;  %v2301_v53 = vmul.f32 %v3862_v37, %v3858_v13 }
0x104a   : > { %v2385_v46 = vsel %vm1033_vm8, %v2374_v40, 0  ;;  %3706 = vmatprep.subr.msk.bf16.mxu1 %vm1033_vm8, %v2374_v40  ;;  %v3866_v47 = vpop.eup %3865  ;;  %v2441_v48 = vpop.permute.xlu1 %2440  ;;  %v2298_v56 = vmul.f32 %v3864_v45, %v3856_v11 }
0x104b   : > { %3629 = vmatpush3.bf16.xpose.msra.mxu1 %v2385_v46  ;;  %v2300_v58 = vmul.f32 %v3866_v47, %v3854_v9  ;;  %v2452_v15 = vsel %vm1033_vm8, %v2441_v48, 0 }
0x104c   : > { %v3868_v51 = vpop.eup %3867 }
0x104d   : > { %v2368_v55 = vpop.permute.xlu0 %2367  ;;  %v2299_v57 = vmul.f32 %v3868_v51, %v3860_v29  ;;  %v2303_v16 = vpack.c.bf16 %v2301_v53, %v2300_v58 }
0x104e   : > { %3630 = vmatprep.mubr.msk.bf16.mxu1 %vm1033_vm8, %v2368_v55  ;;  %v2370_v23 = vpop.permute.xlu1 %2369 }
0x104f   : > { %v2302_v61 = vpack.c.bf16 %v2299_v57, %v2298_v56 }
0x1051   : > { %3622 = vmatprep.mubr.msk.bf16.mxu0 %vm963_vm6, %v2302_v61 }
0x1052   : > { %3623 = vmatmul.mubr.msk.bf16.vlgmr.msra.gmra.mrb[36].mxu0 %vm963_vm6, %v2303_v16  ;;  %3631 = vmatmul.mubr.msk.bf16.vlgmr.msra.gmra.mrb[36].mxu1 %vm1033_vm8, %v2370_v23 }
0x1053   : > { %3635 = vmatpush3.bf16.xpose.msra.mxu0 %v2449_v18  ;;  %3638 = vmatprep.mubr.msk.bf16.mxu0 %vm1033_vm8, %v4602_v7 }
0x1054   : > { %3708 = vmatprep.subr.msk.bf16.mxu0 %vm1033_vm8, %v2441_v48  ;;  %v3797_v48 = vld [vmem:[%s4910_s9 + $0x18] sm:$0xff]  }
0x105b   : > { %3637 = vmatpush3.bf16.xpose.msra.mxu0 %v2452_v15 }
0x105c   : > { %3650 = vmatprep.subr.bf16.mxu0 %v3797_v48 }
0x1062   : > { %3639 = vmatmul.mubr.msk.bf16.vlgmr.msra.gmra.mrb[40].mxu0 %vm1033_vm8, %v4614_v19 }
0x1063   : > { %3651 = vmatpush3.bf16.msra.mxu0 %v3797_v48 }
0x1125   : > { %v4690_v62 = vpop.f32.mrb[36].mxu0  ;;  %v3632_v63 = vpop.f32.mrb[36].mxu1 }
0x1126   : > { %v4692_v0 = vpop.f32.mrb[37].mxu0  ;;  %v2421_v2 = vpop.f32.mrb[37].mxu1 }
0x1127   : > { %v4694_v4 = vpop.f32.mrb[38].mxu0  ;;  %v3633_v54 = vpop.f32.mrb[38].mxu1 }
0x1128   : > { %v2366_v7 = vpack.c.bf16 %v4694_v4, %v4690_v62  ;;  %v4698_v43 = vpop.f32.mrb[39].mxu0  ;;  %v2424_v5 = vpop.f32.mrb[39].mxu1 }
0x1129   : > { %v2365_v52 = vpack.c.bf16 %v4698_v43, %v4692_v0 }
0x1135   : > { %v3640_v6 = vpop.f32.mrb[40].mxu0 }
0x1136   : > { %v2505_v19 = vsel %vm775_vm9, %v3640_v6, %v3632_v63  ;;  %v2488_v49 = vpop.f32.mrb[41].mxu0 }
0x1137   : > { %v2503_v1 = vsel %vm773_vm10, %v2488_v49, %v2421_v2  ;;  %v3641_v3 = vpop.f32.mrb[42].mxu0  ;;  %v2509_v8 = vadd.f32 %v4368_v38, %v2505_v19 }
0x1138   : > { %v2506_v9 = vsel %vm776_vm11, %v3641_v3, %v3633_v54  ;;  %v2491_v10 = vpop.f32.mrb[43].mxu0  ;;  %v2507_v11 = vadd.f32 %v2503_v1, %v4370_v39 }
0x1139   : > { %v2504_v21 = vsel %vm774_vm12, %v2491_v10, %v2424_v5  ;;  %v2510_v13 = vadd.f32 %v4373_v41, %v2506_v9  ;;  %v2517_v26 = vsel %vm963_vm6, %v2509_v8, -inf  ;;  %v3798_v5 = vld [vmem:[%s4910_s9 + $0x10] sm:$0xff]  }
0x113a   : > { %v2511_v24 = vsel %vm963_vm6, %v2507_v11, -inf  ;;  %v2508_v20 = vadd.f32 %v2504_v21, %v4375_v42  ;;  %3656 = vmatprep.subr.bf16.mxu0 %v3798_v5 }
0x113b   : > { %2512 = vmax.xlane.f32.xlu0 %v2511_v24  ;;  %v2520_v27 = vsel %vm963_vm6, %v2510_v13, -inf }
0x113c   : > { %v2514_v38 = vsel %vm963_vm6, %v2508_v20, -inf }
0x113d   : > { %2515 = vmax.xlane.f32.xlu1 %v2514_v38 }
0x113f   : > { %2518 = vmax.xlane.f32.xlu0 %v2517_v26 }
0x1143   : > { %2521 = vmax.xlane.f32.xlu0 %v2520_v27 }
0x11c8   : > { %v2513_v39 = vpop.xlane.xlu0 %2512 }
0x11c9   : > { %v2523_v29 = vsub.f32 %v2507_v11, %v2513_v39  ;;  %v3371_v11 = vld [vmem:[%s4911_s10 + $0x1] ss:$0 sm:$0xff] }
0x11ca   : > { %v2516_v22 = vpop.xlane.xlu1 %2515 }
0x11cb   : > { %v2527_v41 = vmul.f32 1.442695, %v2523_v29  ;;  %v2524_v14 = vsub.f32 %v2508_v20, %v2516_v22 }
0x11cc   : > { %v2519_v50 = vpop.xlane.xlu0 %2518 }
0x11cd   : > { %v2525_v30 = vsub.f32 %v2509_v8, %v2519_v50  ;;  %v2529_v32 = vmul.f32 1.442695, %v2524_v14 }
0x11cf   : > { %v2531_v28 = vmul.f32 1.442695, %v2525_v30 }
0x11d0   : > { %v2522_v31 = vpop.xlane.xlu0 %2521 }
0x11d1   : > { %3869 = vpow2.f32 %v2531_v28  ;;  %v2526_v42 = vsub.f32 %v2510_v13, %v2522_v31 }
0x11d2   : > { %3871 = vpow2.f32 %v2527_v41 }
0x11d3   : > { %v2533_v33 = vmul.f32 1.442695, %v2526_v42 }
0x11d5   : > { %3873 = vpow2.f32 %v2533_v33 }
0x11d6   : > { %3875 = vpow2.f32 %v2529_v32 }
0x11db   : > { %v3870_v34 = vpop.eup %3869 }
0x11dc   : > { %v2541_v35 = vsel %vm963_vm6, %v3870_v34, 0.0  ;;  %v3872_v36 = vpop.eup %3871 }
0x11dd   : > { %2542 = vadd.xlane.f32.xlu1 %v2541_v35  ;;  %v2535_v45 = vsel %vm963_vm6, %v3872_v36, 0.0 }
0x11df   : > { %v3874_v37 = vpop.eup %3873 }
0x11e0   : > { %v2544_v40 = vsel %vm963_vm6, %v3874_v37, 0.0  ;;  %v3876_v46 = vpop.eup %3875 }
0x11e1   : > { %2545 = vadd.xlane.f32.xlu0 %v2544_v40  ;;  %2536 = vadd.xlane.f32.xlu1 %v2535_v45  ;;  %v2538_v47 = vsel %vm963_vm6, %v3876_v46, 0.0  ;;  %v3799_v45 = vld [vmem:[%s4912_s11 + $0x10] sm:$0xff]  }
0x11e5   : > { %2539 = vadd.xlane.f32.xlu0 %v2538_v47  ;;  %v3801_v47 = vld [vmem:[%s4914_s13 + $0x20] sm:$0xff]  }
0x11f2   : > { %2557 = vrot.lane.b32.xlu1 %v4600_v44, %s4983_s3 }
0x11fb   : > { %2559 = vrot.lane.b32.xlu0 %v4612_v17, %s4983_s3  ;;  %s4806_s3 = sand.u32 1, %s4019_s22  }
0x11fc   : > { %s3278_s30 = sshll.u32 %s4806_s3, 5 }
0x11fd   : > { %s652_s1 = scalar_lea.vmem [#allocation5], %s3278_s30 }
0x11fe   : > { %s3141_s26 = sshll.u32 %s652_s1, 4  ;;  %s4823_s26 = int_to_ptr.vmem [resolvable:$true] %s3141_s26 }
0x11ff   : > { %s3929_s5 = scalar_lea.vmem %s4823_s26, 512  ;;  %p3936_p2 = scmp.lt.s32.totalorder %s4823_s26, %s3934_s23 }
0x1200   : > { %p3930_p5 = scmp.ne.s32.totalorder %s4823_s26, %s3929_s5  ;;  %p3937_p3 = scmp.lt.s32.totalorder %s3935_s24, %s3929_s5 }
0x1202   : > { %p3931_p10 = pnand %p3930_p5, %p4984_p9  ;;  %p3938_p4 = por %p3937_p3, %p3936_p2 }
0x1204   : > { %p3932_p12 = pneg %p3931_p10 }
0x1206   : > { %p3939_p7 = pnand %p3938_p4, %p3932_p12 }
0x126a   : > { %v2543_v51 = vpop.xlane.xlu1 %2542 }
0x126e   : > { %v2546_v53 = vpop.xlane.xlu0 %2545  ;;  %v2537_v55 = vpop.xlane.xlu1 %2536 }
0x126f   : > { %3877 = vrcp.f32 %v2546_v53 }
0x1270   : > { %3879 = vrcp.f32 %v2537_v55 }
0x1271   : > { %3881 = vrcp.f32 %v2543_v51 }
0x1272   : > { %v2540_v56 = vpop.xlane.xlu0 %2539  ;;  %v2558_v57 = vpop.permute.xlu1 %2557 }
0x1273   : > { %3883 = vrcp.f32 %v2540_v56  ;;  %3642 = vmatprep.subr.bf16.mxu1 %v2558_v57 }
0x1274   : > { %3643 = vmatpush3.bf16.msra.mxu1 %v2558_v57 }
0x1276   : > { %v2560_v44 = vpop.permute.xlu0 %2559 }
0x1277   : > { %3644 = vmatprep.subr.bf16.mxu1 %v2560_v44 }
0x1278   : > { %3645 = vmatpush3.bf16.msra.mxu1 %v2560_v44 }
0x1279   : > { %v3878_v17 = vpop.eup %3877  ;;  %3662 = vmatprep.subr.bf16.mxu1 %v3799_v45 }
0x127a   : > { %v3880_v58 = vpop.eup %3879  ;;  %v2554_v23 = vmul.f32 %v3878_v17, %v3874_v37 }
0x127b   : > { %v3882_v61 = vpop.eup %3881  ;;  %v2551_v18 = vmul.f32 %v3880_v58, %v3872_v36 }
0x127c   : > { %v2553_v63 = vmul.f32 %v3882_v61, %v3870_v34 }
0x127d   : > { %v3884_v16 = vpop.eup %3883 }
0x127e   : > { %v2552_v15 = vmul.f32 %v3884_v16, %v3876_v46  ;;  %v2556_v54 = vpack.c.bf16 %v2554_v23, %v2553_v63  ;;  %v3800_v46 = vld [vmem:[%s4912_s11 + $0x18] sm:$0xff]  }
0x1280   : > { %v2555_v2 = vpack.c.bf16 %v2552_v15, %v2551_v18  ;;  %v3374_v15 = vld [vmem:[%s4916_s15 + $0x1] ss:$0 sm:$0xff] }
0x1282   : > { %3646 = vmatprep.mubr.msk.bf16.mxu1 %vm963_vm6, %v2555_v2 }
0x1283   : > { %3647 = vmatmul.mubr.msk.bf16.vlgmr.msra.gmra.mrb[40].mxu1 %vm963_vm6, %v2556_v54 }
0x1284   : > { %3663 = vmatpush3.bf16.msra.mxu1 %v3799_v45 }
0x1285   : > { %3664 = vmatprep.subr.bf16.mxu1 %v3800_v46 }
0x1288   : > { %3665 = vmatpush3.bf16.msra.mxu1 %v3800_v46 }
0x1289   : > { %3670 = vmatprep.subr.bf16.mxu1 %v3801_v47 }
0x1356   : > { %v3648_v6 = vpop.f32.mrb[40].mxu1 }
0x1357   : > { %v2603_v19 = vpop.f32.mrb[41].mxu1 }
0x1358   : > { %v3649_v49 = vpop.f32.mrb[42].mxu1 }
0x1359   : > { %v2619_v1 = vpack.c.bf16 %v3649_v49, %v3648_v6  ;;  %v2606_v3 = vpop.f32.mrb[43].mxu1 }
0x135a   : > { %v2618_v8 = vpack.c.bf16 %v2606_v3, %v2603_v19  ;;  %v3375_v19 = vld [vmem:[%s4917_s16 + $0x1] ss:$0 sm:$0xff] }
0x135c   : > { %3652 = vmatprep.mubr.msk.bf16.mxu0 %vm1033_vm8, %v2618_v8 }
0x135d   : > { %3653 = vmatmul.mubr.msk.bf16.vlgmr.msra.gmra.mrb[44].mxu0 %vm1033_vm8, %v2619_v1 }
0x135e   : > { %3657 = vmatpush3.bf16.msra.mxu0 %v3798_v5  ;;  %3658 = vmatprep.mubr.msk.bf16.mxu0 %vm1033_vm8, %v2365_v52 }
0x1369   : > { %3659 = vmatmul.mubr.msk.bf16.vlgmr.msra.gmra.mrb[44].mxu0 %vm1033_vm8, %v2366_v7 }
0x143c   : > { %v3660_v9 = vpop.f32.mrb[44].mxu0 }
0x143d   : > { %v2727_v10 = vpop.f32.mrb[45].mxu0  ;;  %v2744_v21 = vadd.f32 %v3660_v9, %v4588_v12 }
0x143e   : > { %v2742_v13 = vadd.f32 %v2727_v10, %v4578_v59  ;;  %v3661_v24 = vpop.f32.mrb[46].mxu0 }
0x143f   : > { %v2730_v20 = vpop.f32.mrb[47].mxu0  ;;  %v2745_v0 = vadd.f32 %v3661_v24, %v4586_v25  ;;  %v2754_v7 = vadd.f32 %v3371_v11, %v2744_v21 }
0x1440   : > { %v2743_v43 = vadd.f32 %v2730_v20, %v4580_v60  ;;  %v2752_v52 = vadd.f32 %v3371_v11, %v2742_v13 }
0x1441   : > { %v2755_v26 = vadd.f32 %v3371_v11, %v2745_v0  ;;  %v2766_v12 = vsel %vm963_vm6, %v2754_v7, 0.0 }
0x1442   : > { %v2760_v62 = vsel %vm963_vm6, %v2752_v52, 0.0  ;;  %v2753_v4 = vadd.f32 %v3371_v11, %v2743_v43  ;;  %v3802_v43 = vld [vmem:[%s4914_s13 + $0x28] sm:$0xff]  }
0x1443   : > { %2761 = vadd.xlane.f32.xlu1 %v2760_v62  ;;  %v2769_v59 = vsel %vm963_vm6, %v2755_v26, 0.0  ;;  %v3804_v62 = vld [vmem:[%s4914_s13 + $0x38] sm:$0xff]  }
0x1444   : > { %v2763_v38 = vsel %vm963_vm6, %v2753_v4, 0.0 }
0x1445   : > { %2764 = vadd.xlane.f32.xlu0 %v2763_v38 }
0x1447   : > { %2767 = vadd.xlane.f32.xlu1 %v2766_v12 }
0x1449   : > { %2770 = vadd.xlane.f32.xlu0 %v2769_v59 }
0x14d0   : > { %v2762_v27 = vpop.xlane.xlu1 %2761 }
0x14d1   : > { %v2772_v25 = vmul.f32 0.03125, %v2762_v27 }
0x14d2   : > { %v2765_v39 = vpop.xlane.xlu0 %2764 }
0x14d3   : > { %v2776_v60 = vsub.f32 %v2752_v52, %v2772_v25  ;;  %v2773_v29 = vmul.f32 0.03125, %v2765_v39  ;;  %v3803_v52 = vld [vmem:[%s4914_s13 + $0x30] sm:$0xff]  }
0x14d4   : > { %v2768_v22 = vpop.xlane.xlu1 %2767 }
0x14d5   : > { %v2777_v50 = vsub.f32 %v2753_v4, %v2773_v29  ;;  %v2774_v30 = vmul.f32 0.03125, %v2768_v22  ;;  %v2780_v41 = vmul.f32 %v2776_v60, %v2776_v60  ;;  %v3381_v4 = vld [vmem:[%s4913_s12 + $0x1] ss:$0 sm:$0xff] }
0x14d6   : > { %v2771_v14 = vpop.xlane.xlu0 %2770 }
0x14d7   : > { %v2778_v28 = vsub.f32 %v2754_v7, %v2774_v30  ;;  %v2775_v31 = vmul.f32 0.03125, %v2771_v14  ;;  %v2784_v42 = vsel %vm963_vm6, %v2780_v41, 0.0  ;;  %v2781_v32 = vmul.f32 %v2777_v50, %v2777_v50  ;;  %v3395_v14 = vld [vmem:[%s4915_s14 + $0x1] ss:$0 sm:$0xff] }
0x14d8   : > { %2785 = vadd.xlane.f32.xlu1 %v2784_v42 }
0x14d9   : > { %v2779_v33 = vsub.f32 %v2755_v26, %v2775_v31  ;;  %v2787_v34 = vsel %vm963_vm6, %v2781_v32, 0.0  ;;  %v2782_v35 = vmul.f32 %v2778_v28, %v2778_v28 }
0x14da   : > { %2788 = vadd.xlane.f32.xlu0 %v2787_v34 }
0x14db   : > { %v2790_v36 = vsel %vm963_vm6, %v2782_v35, 0.0  ;;  %v2783_v37 = vmul.f32 %v2779_v33, %v2779_v33 }
0x14dc   : > { %2791 = vadd.xlane.f32.xlu1 %v2790_v36 }
0x14dd   : > { %v2793_v40 = vsel %vm963_vm6, %v2783_v37, 0.0 }
0x14de   : > { %2794 = vadd.xlane.f32.xlu0 %v2793_v40 }
0x1565   : > { %v2786_v48 = vpop.xlane.xlu1 %2785 }
0x1566   : > { %v2796_v51 = vmul.f32 0.03125, %v2786_v48 }
0x1567   : > { %v2789_v53 = vpop.xlane.xlu0 %2788 }
0x1568   : > { %v2800_v55 = vadd.f32 1e-05, %v2796_v51  ;;  %v2797_v56 = vmul.f32 0.03125, %v2789_v53 }
0x1569   : > { %v2792_v57 = vpop.xlane.xlu1 %2791 }
0x156a   : > { %3885 = vrsqrt.f32 %v2800_v55  ;;  %v2801_v44 = vadd.f32 1e-05, %v2797_v56  ;;  %v2798_v17 = vmul.f32 0.03125, %v2792_v57 }
0x156b   : > { %v2795_v58 = vpop.xlane.xlu0 %2794 }
0x156c   : > { %3887 = vrsqrt.f32 %v2801_v44  ;;  %v2802_v61 = vadd.f32 1e-05, %v2798_v17  ;;  %v2799_v16 = vmul.f32 0.03125, %v2795_v58 }
0x156e   : > { %3889 = vrsqrt.f32 %v2802_v61  ;;  %v2803_v23 = vadd.f32 1e-05, %v2799_v16 }
0x1570   : > { %3891 = vrsqrt.f32 %v2803_v23 }
0x1574   : > { %v3886_v18 = vpop.eup %3885 }
0x1575   : > { %v2808_v63 = vmul.f32 %v3886_v18, %v2776_v60 }
0x1576   : > { %v3888_v2 = vpop.eup %3887 }
0x1577   : > { %v2809_v54 = vmul.f32 %v3888_v2, %v2777_v50  ;;  %v2818_v5 = vmul.f32 %v3374_v15, %v2808_v63 }
0x1578   : > { %v3890_v6 = vpop.eup %3889 }
0x1579   : > { %v2810_v49 = vmul.f32 %v3890_v6, %v2778_v28  ;;  %v2819_v1 = vmul.f32 %v3374_v15, %v2809_v54  ;;  %v2828_v10 = vadd.f32 %v3375_v19, %v2818_v5 }
0x157a   : > { %v3892_v3 = vpop.eup %3891 }
0x157b   : > { %v2820_v8 = vmul.f32 %v3374_v15, %v2810_v49  ;;  %v2811_v9 = vmul.f32 %v3892_v3, %v2779_v33  ;;  %v2829_v11 = vadd.f32 %v3375_v19, %v2819_v1 }
0x157d   : > { %v2821_v21 = vmul.f32 %v3374_v15, %v2811_v9  ;;  %v2832_v13 = vpack.c.bf16 %v2829_v11, %v2828_v10  ;;  %v2830_v24 = vadd.f32 %v3375_v19, %v2820_v8 }
0x157f   : > { %3666 = vmatprep.mubr.msk.bf16.mxu1 %vm963_vm6, %v2832_v13  ;;  %v2831_v20 = vadd.f32 %v3375_v19, %v2821_v21 }
0x1581   : > { %v2833_v0 = vpack.c.bf16 %v2831_v20, %v2830_v24 }
0x1583   : > { %3667 = vmatmul.mubr.msk.bf16.vlgmr.msra.gmra.mrb[44].mxu1 %vm963_vm6, %v2833_v0 }
0x1584   : > { %3671 = vmatpush3.bf16.msra.mxu1 %v3801_v47 }
0x1585   : > { %3672 = vmatprep.subr.bf16.mxu1 %v3802_v43 }
0x1588   : > { %3673 = vmatpush3.bf16.msra.mxu1 %v3802_v43 }
0x1589   : > { %3674 = vmatprep.subr.bf16.mxu1 %v3803_v52 }
0x158c   : > { %3675 = vmatpush3.bf16.msra.mxu1 %v3803_v52 }
0x158d   : > { %3676 = vmatprep.subr.bf16.mxu1 %v3804_v62 }
0x1590   : > { %3677 = vmatpush3.bf16.msra.mxu1 %v3804_v62 }
0x1656   : > { %v3668_v7 = vpop.f32.mrb[44].mxu1 }
0x1657   : > { %v2908_v38 = vadd.f32 %v3668_v7, %v3381_v4  ;;  %v2899_v26 = vpop.f32.mrb[45].mxu1  ;;  %v3404_v7 = vld [vmem:[%s4918_s17 + $0x1] ss:$0 sm:$0xff] }
0x1658   : > { %v2900_v12 = vadd.f32 %v3381_v4, %v2899_v26  ;;  %v3669_v59 = vpop.f32.mrb[46].mxu1 }
0x1659   : > { %v2911_v27 = vadd.f32 %v3669_v59, %v3381_v4  ;;  %v2902_v25 = vpop.f32.mrb[47].mxu1  ;;  %v2916_v60 = vmax.f32 %v2908_v38, 0.0 }
0x165a   : > { %v2903_v39 = vadd.f32 %v3381_v4, %v2902_v25  ;;  %v2914_v22 = vmax.f32 %v2900_v12, 0.0  ;;  %v3405_v12 = vld [vmem:[%s4919_s18 + $0x1] ss:$0 sm:$0xff] }
0x165b   : > { %v2917_v29 = vmax.f32 %v2911_v27, 0.0 }
0x165c   : > { %v2915_v50 = vmax.f32 %v2903_v39, 0.0 }
0x165d   : > { %v2919_v30 = vpack.c.bf16 %v2917_v29, %v2916_v60 }
0x165e   : > { %v2918_v41 = vpack.c.bf16 %v2915_v50, %v2914_v22 }
0x1660   : > { %3678 = vmatprep.mubr.msk.bf16.mxu1 %vm1870_vm13, %v2918_v41 }
0x1661   : > { %3679 = vmatmul.mubr.msk.bf16.vlgmr.msra.gmra.mrb[48].mxu1 %vm1870_vm13, %v2919_v30 }
0x1734   : > { %v3680_v28 = vpop.f32.mrb[48].mxu1 }
0x1735   : > { %v3001_v31 = vpop.f32.mrb[49].mxu1  ;;  %v3010_v42 = vadd.f32 %v3680_v28, %v3395_v14 }
0x1736   : > { %v3002_v32 = vadd.f32 %v3395_v14, %v3001_v31  ;;  %v3681_v33 = vpop.f32.mrb[50].mxu1 }
0x1737   : > { %v3004_v34 = vpop.f32.mrb[51].mxu1  ;;  %v3013_v35 = vadd.f32 %v3681_v33, %v3395_v14  ;;  %v3018_v46 = vadd.f32 %v3010_v42, %v2830_v24 }
0x1738   : > { %v3005_v36 = vadd.f32 %v3395_v14, %v3004_v34  ;;  %v3016_v37 = vadd.f32 %v3002_v32, %v2828_v10 }
0x1739   : > { %v3019_v48 = vadd.f32 %v3013_v35, %v2831_v20  ;;  %v3030_v51 = vsel %vm963_vm6, %v3018_v46, 0.0 }
0x173a   : > { %v3024_v40 = vsel %vm963_vm6, %v3016_v37, 0.0  ;;  %v3017_v45 = vadd.f32 %v3005_v36, %v2829_v11 }
0x173b   : > { %3025 = vadd.xlane.f32.xlu1 %v3024_v40  ;;  %v3033_v53 = vsel %vm963_vm6, %v3019_v48, 0.0 }
0x173c   : > { %v3027_v47 = vsel %vm963_vm6, %v3017_v45, 0.0 }
0x173d   : > { %3028 = vadd.xlane.f32.xlu0 %v3027_v47 }
0x173f   : > { %3031 = vadd.xlane.f32.xlu1 %v3030_v51 }
0x1741   : > { %3034 = vadd.xlane.f32.xlu0 %v3033_v53 }
0x17c8   : > { %v3026_v55 = vpop.xlane.xlu1 %3025 }
0x17c9   : > { %v3036_v56 = vmul.f32 0.03125, %v3026_v55 }
0x17ca   : > { %v3029_v57 = vpop.xlane.xlu0 %3028 }
0x17cb   : > { %v3040_v44 = vsub.f32 %v3016_v37, %v3036_v56  ;;  %v3037_v17 = vmul.f32 0.03125, %v3029_v57 }
0x17cc   : > { %v3032_v58 = vpop.xlane.xlu1 %3031 }
0x17cd   : > { %v3041_v61 = vsub.f32 %v3017_v45, %v3037_v17  ;;  %v3038_v16 = vmul.f32 0.03125, %v3032_v58  ;;  %v3044_v23 = vmul.f32 %v3040_v44, %v3040_v44 }
0x17ce   : > { %v3035_v18 = vpop.xlane.xlu0 %3034 }
0x17cf   : > { %v3042_v15 = vsub.f32 %v3018_v46, %v3038_v16  ;;  %v3039_v63 = vmul.f32 0.03125, %v3035_v18  ;;  %v3048_v2 = vsel %vm963_vm6, %v3044_v23, 0.0  ;;  %v3045_v54 = vmul.f32 %v3041_v61, %v3041_v61 }
0x17d0   : > { %3049 = vadd.xlane.f32.xlu1 %v3048_v2 }
0x17d1   : > { %v3043_v5 = vsub.f32 %v3019_v48, %v3039_v63  ;;  %v3051_v6 = vsel %vm963_vm6, %v3045_v54, 0.0  ;;  %v3046_v19 = vmul.f32 %v3042_v15, %v3042_v15 }
0x17d2   : > { %3052 = vadd.xlane.f32.xlu0 %v3051_v6 }
0x17d3   : > { %v3054_v49 = vsel %vm963_vm6, %v3046_v19, 0.0  ;;  %v3047_v1 = vmul.f32 %v3043_v5, %v3043_v5 }
0x17d4   : > { %3055 = vadd.xlane.f32.xlu1 %v3054_v49 }
0x17d5   : > { %v3057_v3 = vsel %vm963_vm6, %v3047_v1, 0.0 }
0x17d6   : > { %3058 = vadd.xlane.f32.xlu0 %v3057_v3 }
0x185d   : > { %v3050_v8 = vpop.xlane.xlu1 %3049 }
0x185e   : > { %v3060_v9 = vmul.f32 0.03125, %v3050_v8 }
0x185f   : > { %v3053_v10 = vpop.xlane.xlu0 %3052 }
0x1860   : > { %v3064_v11 = vadd.f32 1e-05, %v3060_v9  ;;  %v3061_v21 = vmul.f32 0.03125, %v3053_v10 }
0x1861   : > { %v3056_v13 = vpop.xlane.xlu1 %3055 }
0x1862   : > { %3893 = vrsqrt.f32 %v3064_v11  ;;  %v3065_v24 = vadd.f32 1e-05, %v3061_v21  ;;  %v3062_v20 = vmul.f32 0.03125, %v3056_v13 }
0x1863   : > { %v3059_v0 = vpop.xlane.xlu0 %3058 }
0x1864   : > { %3895 = vrsqrt.f32 %v3065_v24  ;;  %v3066_v43 = vadd.f32 1e-05, %v3062_v20  ;;  %v3063_v52 = vmul.f32 0.03125, %v3059_v0 }
0x1866   : > { %3897 = vrsqrt.f32 %v3066_v43  ;;  %v3067_v62 = vadd.f32 1e-05, %v3063_v52 }
0x1868   : > { %3899 = vrsqrt.f32 %v3067_v62 }
0x186c   : > { %v3894_v4 = vpop.eup %3893 }
0x186d   : > { %v3072_v38 = vmul.f32 %v3894_v4, %v3040_v44 }
0x186e   : > { %v3896_v26 = vpop.eup %3895 }
0x186f   : > { %v3082_v59 = vmul.f32 %v3404_v7, %v3072_v38  ;;  %v3073_v27 = vmul.f32 %v3896_v26, %v3041_v61 }
0x1870   : > { %v3898_v25 = vpop.eup %3897 }
0x1871   : > { %v3092_v39 = vadd.f32 %v3405_v12, %v3082_v59  ;;  %v3083_v60 = vmul.f32 %v3404_v7, %v3073_v27  ;;  %v3074_v29 = vmul.f32 %v3898_v25, %v3042_v15 }
0x1872   : > { %v3900_v22 = vpop.eup %3899 }
0x1873   : > { %v3101_v50 = vrot.slane %v3092_v39, 4  ;;  %v3093_v30 = vadd.f32 %v3405_v12, %v3083_v60  ;;  %v3084_v41 = vmul.f32 %v3404_v7, %v3074_v29  ;;  %3096 = vst.msk [vmem:[%s652_s1] sm:$0xff] %vm963_vm6, %v3092_v39  ;;  %v3075_v14 = vmul.f32 %v3900_v22, %v3043_v5 }
0x1875   : > { %v3103_v28 = vadd.f32 %v3101_v50, %v3092_v39  ;;  %v3094_v31 = vadd.f32 %v3405_v12, %v3084_v41  ;;  %3097 = vst.msk [vmem:[%s652_s1 + $0x8] sm:$0xff] %vm963_vm6, %v3093_v30  ;;  %v3085_v42 = vmul.f32 %v3404_v7, %v3075_v14  ;;  %v3106_v33 = vrot.slane %v3093_v30, 4 }
0x1877   : > { %v3104_v32 = vadd.f32 %v3103_v28, %v3093_v30  ;;  %3098 = vst.msk [vmem:[%s652_s1 + $0x10] sm:$0xff] %vm963_vm6, %v3094_v31  ;;  %v3095_v34 = vadd.f32 %v3405_v12, %v3085_v42 }
0x1879   : > { %3099 = vst.msk [vmem:[%s652_s1 + $0x18] sm:$0xff] %vm963_vm6, %v3095_v34  ;;  %v3108_v35 = vadd.f32 %v3106_v33, %v3104_v32 }
0x187a   : > { %3942 = shalt.err (!%p3939_p7)
}
0x187b   : > { %s3943_s1 = scalar_lea.hbm %s4821_s0, 512  ;;  %s3947_s25 = scalar_lea.hbm %s4920_s19, 1024 }
0x187c   : > { %p3944_p8 = scmp.ne.s32.totalorder %s4821_s0, %s3943_s1  ;;  %p3948_p1 = scmp.lt.u32.totalorder %s4821_s0, %s4920_s19 }
0x187d   : > { %p3949_p0 = scmp.lt.u32.totalorder %s3947_s25, %s3943_s1  ;;  %p3951_p5 = scmp.lt.u32.totalorder %s3943_s1, %s4821_s0 }
0x187e   : > { %p3945_p11 = pnand %p3944_p8, %p4984_p9 }
0x187f   : > { %p3950_p6 = por %p3949_p0, %p3948_p1 }
0x1880   : > { %p3946_p13 = pneg %p3945_p11 }
0x1881   : > { %p3952_p10 = por %p3951_p5, %p3950_p6 }
0x1883   : > { %p3953_p12 = pnand %p3952_p10, %p3946_p13 }
0x1885   : > { %3956 = shalt.err (!%p3953_p12)
}
0x1886   : > { %s4040_s5 = smov 128   ;;  %s4041_s24 = smov 8   ;;  %v3109_v36 = vadd.f32 %v3108_v35, %v3094_v31  ;;  %v3111_v37 = vrot.slane %v3094_v31, 4  ;;  %v3116_v46 = vrot.slane %v3095_v34, 4  ;;  %vm3120_vm14 = vcmask 257024  }
0x1887   : > { %s4985_s30 = scalar_lea.sflag [#allocation4], %s4806_s3  ;;  %s3410_s6 = sshll.u32 %s4169_s2, 6 }
0x1888   : > { %3713 = dma.vmem_to_hbm [thread:$0]  (%p4984_p9), %s4823_s26, 512, %s4821_s0, %s4985_s30, %s4040_s5, %s4040_s5, %s4041_s24   ;;  %v3113_v40 = vadd.f32 %v3111_v37, %v3109_v36 }
0x1889   : > { %s4986_s21 = sshll.u32 %s4806_s3, 2  ;;  %s4858_s8 = scalar_lea.hbm %s4921_s20, %s3410_s6 }
0x188a   : > { %v3114_v45 = vadd.f32 %v3113_v40, %v3095_v34  ;;  %s659_s1 = scalar_lea.vmem [#allocation6], %s4986_s21  ;;  %s3128_s26 = scalar_lea.sflag [#allocation7], %s4806_s3 }
0x188b   : > { %s3157_s25 = sshll.u32 %s659_s1, 4  ;;  %s4042_s2 = smov [#allocation6]   ;;  %s4860_s25 = int_to_ptr.vmem [resolvable:$true] %s3157_s25 }
0x188c   : > { %v3118_v47 = vadd.f32 %v3116_v46, %v3114_v45  ;;  %s3957_s0 = scalar_lea.vmem %s4860_s25, 64  ;;  %s3961_s5 = sshll.u32 %s4042_s2, 4  ;;  %s3962_s5 = int_to_ptr.vmem [resolvable:$false] %s3961_s5 }
0x188d   : > { %p3958_p2 = scmp.ne.s32.totalorder %s4860_s25, %s3957_s0  ;;  %s3963_s24 = scalar_lea.vmem %s3962_s5, 128 }
0x188e   : > { %v3119_v48 = vmul.f32 0.125, %v3118_v47  ;;  %p3964_p7 = scmp.lt.s32.totalorder %s4860_s25, %s3962_s5  ;;  %p3965_p8 = scmp.lt.s32.totalorder %s3963_s24, %s3957_s0 }
0x188f   : > { %p3959_p3 = pnand %p3958_p2, %p4984_p9 }
0x1890   : > { %3121 = vst.msk [vmem:[%s659_s1] sm:$0xf] %vm3120_vm14, %v3119_v48  ;;  %p3966_p11 = por %p3965_p8, %p3964_p7 }
0x1891   : > { %p3960_p4 = pneg %p3959_p3 }
0x1893   : > { %p3967_p13 = pnand %p3966_p11, %p3960_p4 }
0x1895   : > { %3970 = shalt.err (!%p3967_p13)
}
0x1896   : > { %s3971_s7 = scalar_lea.hbm %s4858_s8, 64  ;;  %s3975_s6 = scalar_lea.hbm %s4921_s20, 128 }
0x1897   : > { %p3972_p1 = scmp.ne.s32.totalorder %s4858_s8, %s3971_s7  ;;  %p3976_p5 = scmp.lt.u32.totalorder %s4858_s8, %s4921_s20 }
0x1898   : > { %p3977_p10 = scmp.lt.u32.totalorder %s3975_s6, %s3971_s7  ;;  %p3979_p2 = scmp.lt.u32.totalorder %s3971_s7, %s4858_s8 }
0x1899   : > { %p3973_p0 = pnand %p3972_p1, %p4984_p9 }
0x189a   : > { %p3978_p12 = por %p3977_p10, %p3976_p5 }
0x189b   : > { %p3974_p6 = pneg %p3973_p0 }
0x189c   : > { %p3980_p3 = por %p3979_p2, %p3978_p12 }
0x189e   : > { %p3981_p4 = pnand %p3980_p3, %p3974_p6 }
0x18a0   : > { %3984 = shalt.err (!%p3981_p4)
}
0x18a1   : > { %3714 = dma.vmem_to_hbm [thread:$0]  (%p4984_p9), %s4860_s25, 64, %s4858_s8, %s3128_s26  }
0x18a2 PF: > { %s4987_s23 = sld [smem:[#allocation13_spill]]  ;;  %s4988_s0 = sld [smem:[#allocation11_spill]] }
0x18a3   : > { %s4989_s2 = sld [smem:[#allocation16_spill]] }
0x18a8   : > { %p3730_p7 = scmp.ge.s32.totalorder %s4987_s23, 2  ;;  %s3169_s5 = sand.u32 1, %s4988_s0  }
0x18a9   : > { %p4990_p8 = scmp.ne.s32.totalorder %s4989_s2, 0  ;;  %s3170_s24 = scalar_lea.sflag [#allocation4], %s3169_s5 }
0x18ab   : > { %p3722_p11 = pnand %p3730_p7, %p4990_p8 }
0x18ad   : > { %4006 = dma.done.wait (!%p3722_p11), %s3170_s24, 512  }
0x18ae   : > { %4008 = vsyncadd (!%p3722_p11), %s3170_s24, 4294966784  ;;  %s3179_s7 = scalar_lea.sflag [#allocation7], %s3169_s5 }
0x18af   : > { %4010 = dma.done.wait (!%p3722_p11), %s3179_s7, 64  }
0x18b0   : > { %4012 = vsyncadd (!%p3722_p11), %s3179_s7, 4294967232  ;;  %s4991_s24 = sld [smem:[#allocation14_spill]]  ;;  %s4992_s4 = sld [smem:[#allocation12_spill]] }
0x18b1   : > { %s4993_s23 = sld [smem:[#allocation15_spill]]  ;;  %s4994_s1 = smov %s4019_s22 }
0x18b6   : > { %p35_p9 = scmp.ge.s32.totalorder %s4991_s24, 4   ;;  %s4995_s22 = smov %s4992_s4 }
0x18b8   :  { %37 = sbr.rel (!%p35_p9) target bundleno = 16 (0x10), region = 168 }
0x18bf   :  { %3184 = vsyncpa [#allocation3], 1 }
0x18c0   :  { %3186 = vsyncpa [#allocation3 + $0x1], 1 }
0x18c1   :  { %3187 = vsyncpa [#allocation4], 1 }
0x18c2   :  { %3189 = vsyncpa [#allocation4 + $0x1], 1 }
0x18c3   :  { %3190 = vsyncpa [#allocation7], 1 }
0x18c4   :  { %3192 = vsyncpa [#allocation7 + $0x1], 1 }

</bundles_post_ra>
